<compile_context>
chip_gen: v7x
topology: tpu7x:2x2x1
jax: 0.10.0
libtpu: 0.0.40
codegen_flags: <defaults>
</compile_context>

<pallas_src>
import math

import jax
import jax.numpy as jnp
from jax.experimental import pallas as pl
from jax.experimental.pallas import tpu as pltpu


def _row_taps(stride):
    """Static per-output-row-phase tap structure.

    For output row p = stride*i + a, returns, per phase a, a list of
    (padded_row_offset, (kh indices to sum)) pairs, where padded_row_offset is relative to a
    window whose row 0 is pre-upsample row i-1.
    """
    if stride == 1:
        return [[(0, (0,)), (1, (1,)), (2, (2,))]]        # plain 3x3 conv
    taps = []
    for a in range(stride):
        if a == 0:
            taps.append([(0, (0,)), (1, (1, 2))])          # rows i-1, i
        elif a == stride - 1:
            taps.append([(1, (0, 1)), (2, (2,))])          # rows i, i+1
        else:
            taps.append([(1, (0, 1, 2))])                  # row i only
    return taps


def _effective_row_weights(w, stride):
    """Precompute per-(phase, row-tap) weights: each piece is sum_{kh in set} w[kh] -> (3,cin,cout)."""
    taps = _row_taps(stride)
    pieces = []
    for per_phase in taps:
        for _rb, khs in per_phase:
            acc = w[khs[0]]
            for kh in khs[1:]:
                acc = acc + w[kh]
            pieces.append(acc)
    return jnp.stack(pieces, axis=0), taps                 # (T, 3, cin, cout), static taps


def _make_upsample_conv_kernel(stride, th_in, h_in, w_in, taps):
    """Fused nearest-upsample(stride) + zero-pad(1) + 3x3 conv for one output row tile."""
    s = stride
    tile_h = th_in * s
    w_out = w_in * s
    n_phases = len(taps)                                   # == s (1 when s == 1)

    def kernel(x_ref, weff_ref, b_ref, out_ref, xw_ref, acc_ref):
        # x_ref   : (h_in, w_in, cin)                whole pre-upsample image (one batch item)
        # weff_ref: (T, 3, cin, cout)                effective per-row-tap weights
        # b_ref   : (1, cout)
        # out_ref : (tile_h, w_out, cout)            output row tile
        # xw_ref  : (th_in + 2, w_out + 2, cin)      VMEM scratch: W-upsampled + padded window
        # acc_ref : (th_in, n_phases, w_out, cout)   VMEM scratch: per-phase results
        t = pl.program_id(1)
        cin = x_ref.shape[-1]
        cout = out_ref.shape[-1]
        dt = x_ref.dtype
        r0 = t * th_in                                     # first pre-upsample row of this tile

        # ---- build the W-upsampled + padded window in VMEM (no HBM round trip) ----
        # left / right halo columns: always the conv's zero padding (W is not tiled).
        xw_ref[:, 0:1, :] = jnp.zeros((th_in + 2, 1, cin), dt)
        xw_ref[:, w_out + 1:w_out + 2, :] = jnp.zeros((th_in + 2, 1, cin), dt)

        # core rows: th_in pre-upsample rows, nearest-repeated along W only.
        core = x_ref[pl.ds(r0, th_in), :, :]                          # (th_in, w_in, cin)
        xw_ref[1:th_in + 1, 1:w_out + 1, :] = jnp.repeat(core, s, axis=1)

        # top halo row: pre-upsample row r0 - 1, or zero padding for the first tile.
        @pl.when(t == 0)
        def _():
            xw_ref[0:1, 1:w_out + 1, :] = jnp.zeros((1, w_out, cin), dt)

        @pl.when(t > 0)
        def _():
            top = x_ref[pl.ds(r0 - 1, 1), :, :]
            xw_ref[0:1, 1:w_out + 1, :] = jnp.repeat(top, s, axis=1)

        # bottom halo row: pre-upsample row r0 + th_in, or zero padding for the last tile.
        t_last = pl.num_programs(1) - 1

        @pl.when(t == t_last)
        def _():
            xw_ref[th_in + 1:th_in + 2, 1:w_out + 1, :] = jnp.zeros((1, w_out, cin), dt)

        @pl.when(t < t_last)
        def _():
            bot = x_ref[pl.ds(r0 + th_in, 1), :, :]
            xw_ref[th_in + 1:th_in + 2, 1:w_out + 1, :] = jnp.repeat(bot, s, axis=1)

        # ---- per-row-phase conv: <= 2 row taps x 3 column taps of (th_in*w_out, cin)x(cin, cout) ----
        bias = b_ref[0, :].astype(jnp.float32)[None, None, :]
        flat = 0
        for a, phase_taps in enumerate(taps):              # static Python loops
            p = None
            for rb, _khs in phase_taps:
                for kw in range(3):
                    patch = xw_ref[rb:rb + th_in, kw:kw + w_out, :]
                    wk = weff_ref[flat, kw, :, :]
                    contrib = jnp.einsum("hwc,cd->hwd", patch, wk,
                                         preferred_element_type=jnp.float32)
                    p = contrib if p is None else p + contrib
                flat += 1
            # phase a owns output rows s*i + a of this tile.
            acc_ref[:, a:a + 1, :, :] = (p + bias).astype(acc_ref.dtype)[:, None, :, :]

        # interleave phases: (th_in, n_phases, w_out, cout) -> (tile_h, w_out, cout).
        # Only leading dims are merged: no sublane/lane relayout.
        out_ref[...] = acc_ref[...].reshape(tile_h, w_out, cout)

    return kernel


def _pick_input_row_tile(h_in, w_in, cin, cout, stride, itemsize,
                         vmem_budget_bytes=32 * 1024 * 1024):
    """Largest pre-upsample row tile th_in that divides h_in and fits the VMEM budget."""
    s = stride
    w_out = w_in * s
    in_bytes = 2 * h_in * w_in * cin * itemsize            # double-buffered pre-upsample image
    wgt_bytes = 2 * (2 * s + 2) * 3 * cin * cout * itemsize
    best = 1
    for th in range(1, h_in + 1):
        if h_in % th:
            continue
        tile_h = th * s
        window = (th + 2) * (w_out + 2) * cin * itemsize   # W-upsampled + padded window
        out_bufs = 2 * tile_h * w_out * cout * itemsize    # double-buffered output tile
        acc = tile_h * w_out * cout * itemsize             # per-phase scratch
        live = th * w_out * cout * 4                       # one live f32 phase accumulator
        if in_bytes + wgt_bytes + window + out_bufs + acc + live <= vmem_budget_bytes:
            best = th
    return best


def upsample_conv_nhwc(x_nhwc, w, b, *, stride=2, tile_h=None,
                       vmem_limit_bytes=48 * 1024 * 1024):
    """Fused nearest-upsample(stride) + 3x3 'same' conv; NHWC in / NHWC out."""
    n, h_in, w_in, cin = x_nhwc.shape
    cout = w.shape[-1]
    s = stride
    h_out, w_out = h_in * s, w_in * s

    if tile_h is None:
        th_in = _pick_input_row_tile(h_in, w_in, cin, cout, s, x_nhwc.dtype.itemsize)
    else:
        assert tile_h % s == 0 and h_in % (tile_h // s) == 0, (tile_h, s, h_in)
        th_in = tile_h // s
    tile_h = th_in * s
    n_row_tiles = h_in // th_in

    weff, taps = _effective_row_weights(w, s)
    weff = weff.astype(x_nhwc.dtype)
    n_taps = weff.shape[0]
    n_phases = len(taps)

    kernel = _make_upsample_conv_kernel(s, th_in, h_in, w_in, taps)

    return pl.pallas_call(
        kernel,
        out_shape=jax.ShapeDtypeStruct((n, h_out, w_out, cout), x_nhwc.dtype),
        grid=(n, n_row_tiles),
        in_specs=[
            # Whole pre-upsample image; its block index is constant along the row-tile axis,
            # so it is DMA'd once per batch item and reused for every row tile.
            pl.BlockSpec((None, h_in, w_in, cin), lambda bi, t: (bi, 0, 0, 0)),
            pl.BlockSpec((n_taps, 3, cin, cout), lambda bi, t: (0, 0, 0, 0)),
            pl.BlockSpec((1, cout), lambda bi, t: (0, 0)),
        ],
        out_specs=pl.BlockSpec((None, tile_h, w_out, cout), lambda bi, t: (bi, t, 0, 0)),
        scratch_shapes=[
            pltpu.VMEM((th_in + 2, w_out + 2, cin), x_nhwc.dtype),        # padded window
            pltpu.VMEM((th_in, n_phases, w_out, cout), x_nhwc.dtype),     # per-phase results
        ],
        compiler_params=pltpu.CompilerParams(
            dimension_semantics=("parallel", "parallel"),
            vmem_limit_bytes=vmem_limit_bytes),
    )(x_nhwc, weff, b)


class Upsample:
    """JAX/Pallas equivalent of the PyTorch Upsample module (NCHW in / NCHW out)."""

    def __init__(self, in_channels, with_conv, stride=2, *, key=None):
        self.with_conv = with_conv
        self.stride = stride
        if self.with_conv:
            if key is None:
                key = jax.random.PRNGKey(0)
            k_w, k_b = jax.random.split(key)
            fan_in = in_channels * 3 * 3
            bound = 1.0 / math.sqrt(fan_in)      # PyTorch Conv2d default init range
            # PyTorch weight layout OIHW -> kernel layout (kh, kw, Cin, Cout)
            self.w_oihw = jax.random.uniform(
                k_w, (in_channels, in_channels, 3, 3), jnp.float32, -bound, bound)
            self.w = jnp.transpose(self.w_oihw, (2, 3, 1, 0))
            self.b = jax.random.uniform(k_b, (1, in_channels), jnp.float32, -bound, bound)

    def __call__(self, x_nchw, *, tile_h=None):
        s = self.stride
        if not self.with_conv:
            # interpolate(mode='nearest') only: pure data movement, leave to XLA.
            return jnp.repeat(jnp.repeat(x_nchw, s, axis=2), s, axis=3)
        # NOTE: an NHWC model should call `upsample_conv_nhwc` directly and drop these two
        # transposes (each is a full HBM read+write done by XLA outside the kernel).
        x_nhwc = jnp.transpose(x_nchw, (0, 2, 3, 1))
        y_nhwc = upsample_conv_nhwc(x_nhwc, self.w, self.b, stride=s, tile_h=tile_h)
        return jnp.transpose(y_nhwc, (0, 3, 1, 2))


def _reference_forward(x_nchw, mod):
    """Pure-JAX (lax.conv) reference of the PyTorch forward pass."""
    s = mod.stride
    x = jnp.repeat(jnp.repeat(x_nchw, s, axis=2), s, axis=3)
    if mod.with_conv:
        y = jax.lax.conv_general_dilated(
            x, mod.w_oihw, window_strides=(1, 1), padding=((1, 1), (1, 1)),
            dimension_numbers=("NCHW", "OIHW", "NCHW"))
        x = y + mod.b[0][None, :, None, None]
    return x


if __name__ == "__main__":
    key = jax.random.PRNGKey(0)
    k_x, k_p, k_x3, k_p3 = jax.random.split(key, 4)

    # --- stride 2, with conv -------------------------------------------------------------
    N, C, H, W = 2, 4, 16, 16
    x = jax.random.normal(k_x, (N, C, H, W), jnp.float32)
    mod = Upsample(in_channels=C, with_conv=True, stride=2, key=k_p)
    y_ref = _reference_forward(x, mod)

    # tile_h=8 -> 4 row tiles per image: exercises the top/bottom halo reconstruction.
    y = jax.block_until_ready(mod(x, tile_h=8))
    assert y.shape == (N, C, 2 * H, 2 * W), y.shape
    assert jnp.allclose(y, y_ref, atol=1e-4, rtol=1e-4), float(jnp.max(jnp.abs(y - y_ref)))

    # auto-picked tile (whole image fits in one row tile at this size).
    y2 = jax.block_until_ready(mod(x))
    assert jnp.allclose(y2, y_ref, atol=1e-4, rtol=1e-4), float(jnp.max(jnp.abs(y2 - y_ref)))

    # --- stride 3, with conv (exercises the interior row phase) ---------------------------
    N3, C3, H3, W3 = 1, 4, 8, 8
    x3 = jax.random.normal(k_x3, (N3, C3, H3, W3), jnp.float32)
    mod3 = Upsample(in_channels=C3, with_conv=True, stride=3, key=k_p3)
    y3_ref = _reference_forward(x3, mod3)
    y3 = jax.block_until_ready(mod3(x3, tile_h=12))   # th_in=4 -> 2 row tiles
    assert y3.shape == (N3, C3, 3 * H3, 3 * W3), y3.shape
    assert jnp.allclose(y3, y3_ref, atol=1e-4, rtol=1e-4), float(jnp.max(jnp.abs(y3 - y3_ref)))

    # --- upsample-only path (with_conv=False) ----------------------------------------------
    mod_nc = Upsample(in_channels=C, with_conv=False, stride=2)
    y4 = jax.block_until_ready(mod_nc(x))
    assert jnp.allclose(y4, _reference_forward(x, mod_nc))

    print("KERNEL_OK")
</pallas_src>

<mosaic_0001>
module attributes {stable_mosaic.version = 11 : i64} {
  func.func @kernel(%arg0: i32, %arg1: i32, %arg2: memref<1x16x16x4xf32, #tpu.memory_space<vmem>>, %arg3: memref<4x3x4x4xf32, #tpu.memory_space<vmem>>, %arg4: memref<1x4xf32, #tpu.memory_space<vmem>>, %arg5: memref<1x8x32x4xf32, #tpu.memory_space<vmem>>, %arg6: memref<6x34x4xf32, #tpu.memory_space<vmem>>, %arg7: memref<4x2x32x4xf32, #tpu.memory_space<vmem>>) attributes {dimension_semantics = [#tpu.dimension_semantics<parallel>, #tpu.dimension_semantics<parallel>], iteration_bounds = array<i64: 2, 4>, scalar_prefetch = 0 : i64, scratch_operands = 2 : i64, tpu.core_type = #tpu.core_type<tc>, window_params = [{transform_indices = @transform_0, window_bounds = array<i64: 1, 16, 16, 4>}, {pipeline_mode = #tpu.pipeline_mode<synchronous>, transform_indices = @transform_1, window_bounds = array<i64: 4, 3, 4, 4>}, {pipeline_mode = #tpu.pipeline_mode<synchronous>, transform_indices = @transform_2, window_bounds = array<i64: 1, 4>}, {transform_indices = @transform_3, window_bounds = array<i64: 1, 8, 32, 4>}]} {
    %c4_i32 = arith.constant 4 : i32
    %0 = arith.muli %arg1, %c4_i32 : i32
    %cst = arith.constant 0.000000e+00 : f32
    %1 = vector.broadcast %cst : f32 to vector<6x1x4xf32>
    %c0 = arith.constant 0 : index
    %c0_0 = arith.constant 0 : index
    %c0_1 = arith.constant 0 : index
    %2 = vector.load %arg6[%c0, %c0_0, %c0_1] : memref<6x34x4xf32, #tpu.memory_space<vmem>>, vector<6x1x4xf32>
    tpu.vector_store %arg6[%c0, %c0_0, %c0_1], %1 {strides = array<i32>} : memref<6x34x4xf32, #tpu.memory_space<vmem>>, vector<6x1x4xf32>,
    %cst_2 = arith.constant 0.000000e+00 : f32
    %3 = vector.broadcast %cst_2 : f32 to vector<6x1x4xf32>
    %c0_3 = arith.constant 0 : index
    %c33 = arith.constant 33 : index
    %c0_4 = arith.constant 0 : index
    %4 = vector.load %arg6[%c0_3, %c33, %c0_4] : memref<6x34x4xf32, #tpu.memory_space<vmem>>, vector<6x1x4xf32>
    tpu.vector_store %arg6[%c0_3, %c33, %c0_4], %3 {strides = array<i32>} : memref<6x34x4xf32, #tpu.memory_space<vmem>>, vector<6x1x4xf32>,
    %c0_5 = arith.constant 0 : index
    %5 = arith.index_cast %0 : i32 to index
    %c0_6 = arith.constant 0 : index
    %c0_7 = arith.constant 0 : index
    %6 = vector.load %arg2[%c0_5, %5, %c0_6, %c0_7] : memref<1x16x16x4xf32, #tpu.memory_space<vmem>>, vector<1x4x16x4xf32>
    %7 = vector.shape_cast %6 : vector<1x4x16x4xf32> to vector<4x16x4xf32>
    %8 = vector.shape_cast %7 : vector<4x16x4xf32> to vector<4x16x1x4xf32>
    %9 = vector.broadcast %8 : vector<4x16x1x4xf32> to vector<4x16x2x4xf32>
    %10 = vector.shape_cast %9 : vector<4x16x2x4xf32> to vector<4x32x4xf32>
    %c1 = arith.constant 1 : index
    %c1_8 = arith.constant 1 : index
    %c0_9 = arith.constant 0 : index
    %11 = vector.load %arg6[%c1, %c1_8, %c0_9] : memref<6x34x4xf32, #tpu.memory_space<vmem>>, vector<4x32x4xf32>
    tpu.vector_store %arg6[%c1, %c1_8, %c0_9], %10 {strides = array<i32>} : memref<6x34x4xf32, #tpu.memory_space<vmem>>, vector<4x32x4xf32>,
    %c0_i32 = arith.constant 0 : i32
    %12 = arith.cmpi eq, %arg1, %c0_i32 : i32
    %13 = arith.extui %12 : i1 to i32
    %c0_i32_10 = arith.constant 0 : i32
    %14 = arith.cmpi ne, %13, %c0_i32_10 : i32
    scf.if %14 {
      %cst_128 = arith.constant 0.000000e+00 : f32
      %98 = vector.broadcast %cst_128 : f32 to vector<1x32x4xf32>
      %c0_129 = arith.constant 0 : index
      %c1_130 = arith.constant 1 : index
      %c0_131 = arith.constant 0 : index
      %99 = vector.load %arg6[%c0_129, %c1_130, %c0_131] : memref<6x34x4xf32, #tpu.memory_space<vmem>>, vector<1x32x4xf32>
      tpu.vector_store %arg6[%c0_129, %c1_130, %c0_131], %98 {strides = array<i32>} : memref<6x34x4xf32, #tpu.memory_space<vmem>>, vector<1x32x4xf32>,
    } else {
    }
    %c0_i32_11 = arith.constant 0 : i32
    %15 = arith.cmpi sgt, %arg1, %c0_i32_11 : i32
    %16 = arith.extui %15 : i1 to i32
    %c0_i32_12 = arith.constant 0 : i32
    %17 = arith.cmpi ne, %16, %c0_i32_12 : i32
    scf.if %17 {
      %c1_i32 = arith.constant 1 : i32
      %98 = arith.subi %0, %c1_i32 : i32
      %c0_128 = arith.constant 0 : index
      %99 = arith.index_cast %98 : i32 to index
      %c0_129 = arith.constant 0 : index
      %c0_130 = arith.constant 0 : index
      %100 = vector.load %arg2[%c0_128, %99, %c0_129, %c0_130] : memref<1x16x16x4xf32, #tpu.memory_space<vmem>>, vector<1x1x16x4xf32>
      %101 = vector.shape_cast %100 : vector<1x1x16x4xf32> to vector<1x16x4xf32>
      %102 = vector.shape_cast %101 : vector<1x16x4xf32> to vector<1x16x1x4xf32>
      %103 = vector.broadcast %102 : vector<1x16x1x4xf32> to vector<1x16x2x4xf32>
      %104 = vector.shape_cast %103 : vector<1x16x2x4xf32> to vector<1x32x4xf32>
      %c0_131 = arith.constant 0 : index
      %c1_132 = arith.constant 1 : index
      %c0_133 = arith.constant 0 : index
      %105 = vector.load %arg6[%c0_131, %c1_132, %c0_133] : memref<6x34x4xf32, #tpu.memory_space<vmem>>, vector<1x32x4xf32>
      tpu.vector_store %arg6[%c0_131, %c1_132, %c0_133], %104 {strides = array<i32>} : memref<6x34x4xf32, #tpu.memory_space<vmem>>, vector<1x32x4xf32>,
    } else {
    }
    %c3_i32 = arith.constant 3 : i32
    %18 = arith.cmpi eq, %arg1, %c3_i32 : i32
    %19 = arith.extui %18 : i1 to i32
    %c0_i32_13 = arith.constant 0 : i32
    %20 = arith.cmpi ne, %19, %c0_i32_13 : i32
    scf.if %20 {
      %cst_128 = arith.constant 0.000000e+00 : f32
      %98 = vector.broadcast %cst_128 : f32 to vector<1x32x4xf32>
      %c5 = arith.constant 5 : index
      %c1_129 = arith.constant 1 : index
      %c0_130 = arith.constant 0 : index
      %99 = vector.load %arg6[%c5, %c1_129, %c0_130] : memref<6x34x4xf32, #tpu.memory_space<vmem>>, vector<1x32x4xf32>
      tpu.vector_store %arg6[%c5, %c1_129, %c0_130], %98 {strides = array<i32>} : memref<6x34x4xf32, #tpu.memory_space<vmem>>, vector<1x32x4xf32>,
    } else {
    }
    %c3_i32_14 = arith.constant 3 : i32
    %21 = arith.cmpi slt, %arg1, %c3_i32_14 : i32
    %22 = arith.extui %21 : i1 to i32
    %c0_i32_15 = arith.constant 0 : i32
    %23 = arith.cmpi ne, %22, %c0_i32_15 : i32
    scf.if %23 {
      %c4_i32_128 = arith.constant 4 : i32
      %98 = arith.addi %0, %c4_i32_128 : i32
      %c0_129 = arith.constant 0 : index
      %99 = arith.index_cast %98 : i32 to index
      %c0_130 = arith.constant 0 : index
      %c0_131 = arith.constant 0 : index
      %100 = vector.load %arg2[%c0_129, %99, %c0_130, %c0_131] : memref<1x16x16x4xf32, #tpu.memory_space<vmem>>, vector<1x1x16x4xf32>
      %101 = vector.shape_cast %100 : vector<1x1x16x4xf32> to vector<1x16x4xf32>
      %102 = vector.shape_cast %101 : vector<1x16x4xf32> to vector<1x16x1x4xf32>
      %103 = vector.broadcast %102 : vector<1x16x1x4xf32> to vector<1x16x2x4xf32>
      %104 = vector.shape_cast %103 : vector<1x16x2x4xf32> to vector<1x32x4xf32>
      %c5 = arith.constant 5 : index
      %c1_132 = arith.constant 1 : index
      %c0_133 = arith.constant 0 : index
      %105 = vector.load %arg6[%c5, %c1_132, %c0_133] : memref<6x34x4xf32, #tpu.memory_space<vmem>>, vector<1x32x4xf32>
      tpu.vector_store %arg6[%c5, %c1_132, %c0_133], %104 {strides = array<i32>} : memref<6x34x4xf32, #tpu.memory_space<vmem>>, vector<1x32x4xf32>,
    } else {
    }
    %c0_16 = arith.constant 0 : index
    %c0_17 = arith.constant 0 : index
    %24 = vector.load %arg4[%c0_16, %c0_17] : memref<1x4xf32, #tpu.memory_space<vmem>>, vector<1x4xf32>
    %25 = vector.shape_cast %24 : vector<1x4xf32> to vector<4xf32>
    %26 = vector.shape_cast %25 : vector<4xf32> to vector<1x1x4xf32>
    %c0_18 = arith.constant 0 : index
    %c0_19 = arith.constant 0 : index
    %c0_20 = arith.constant 0 : index
    %27 = vector.load %arg6[%c0_18, %c0_19, %c0_20] : memref<6x34x4xf32, #tpu.memory_space<vmem>>, vector<4x32x4xf32>
    %c0_21 = arith.constant 0 : index
    %c0_22 = arith.constant 0 : index
    %c0_23 = arith.constant 0 : index
    %c0_24 = arith.constant 0 : index
    %28 = vector.load %arg3[%c0_21, %c0_22, %c0_23, %c0_24] : memref<4x3x4x4xf32, #tpu.memory_space<vmem>>, vector<1x1x4x4xf32>
    %29 = vector.shape_cast %28 : vector<1x1x4x4xf32> to vector<4x4xf32>
    "tpu.trace_start"() <{level = 10 : i32, message = "hwc,cd->hwd"}> : () -> ()
    %cst_25 = arith.constant dense<0.000000e+00> : vector<4x32x4xf32>
    %30 = tpu.matmul %27, %29, %cst_25 {dimension_numbers = #tpu.dot_dimension_numbers<[2], [0], [0, 1], [1], [0, 0, 0, 1, 1, 1], [], []>} : vector<4x32x4xf32>, vector<4x4xf32>, vector<4x32x4xf32> -> vector<4x32x4xf32>
    "tpu.trace_stop"() : () -> ()
    %c0_26 = arith.constant 0 : index
    %c1_27 = arith.constant 1 : index
    %c0_28 = arith.constant 0 : index
    %31 = vector.load %arg6[%c0_26, %c1_27, %c0_28] : memref<6x34x4xf32, #tpu.memory_space<vmem>>, vector<4x32x4xf32>
    %c0_29 = arith.constant 0 : index
    %c1_30 = arith.constant 1 : index
    %c0_31 = arith.constant 0 : index
    %c0_32 = arith.constant 0 : index
    %32 = vector.load %arg3[%c0_29, %c1_30, %c0_31, %c0_32] : memref<4x3x4x4xf32, #tpu.memory_space<vmem>>, vector<1x1x4x4xf32>
    %33 = vector.shape_cast %32 : vector<1x1x4x4xf32> to vector<4x4xf32>
    "tpu.trace_start"() <{level = 10 : i32, message = "hwc,cd->hwd"}> : () -> ()
    %cst_33 = arith.constant dense<0.000000e+00> : vector<4x32x4xf32>
    %34 = tpu.matmul %31, %33, %cst_33 {dimension_numbers = #tpu.dot_dimension_numbers<[2], [0], [0, 1], [1], [0, 0, 0, 1, 1, 1], [], []>} : vector<4x32x4xf32>, vector<4x4xf32>, vector<4x32x4xf32> -> vector<4x32x4xf32>
    "tpu.trace_stop"() : () -> ()
    %35 = arith.addf %30, %34 : vector<4x32x4xf32>
    %c0_34 = arith.constant 0 : index
    %c2 = arith.constant 2 : index
    %c0_35 = arith.constant 0 : index
    %36 = vector.load %arg6[%c0_34, %c2, %c0_35] : memref<6x34x4xf32, #tpu.memory_space<vmem>>, vector<4x32x4xf32>
    %c0_36 = arith.constant 0 : index
    %c2_37 = arith.constant 2 : index
    %c0_38 = arith.constant 0 : index
    %c0_39 = arith.constant 0 : index
    %37 = vector.load %arg3[%c0_36, %c2_37, %c0_38, %c0_39] : memref<4x3x4x4xf32, #tpu.memory_space<vmem>>, vector<1x1x4x4xf32>
    %38 = vector.shape_cast %37 : vector<1x1x4x4xf32> to vector<4x4xf32>
    "tpu.trace_start"() <{level = 10 : i32, message = "hwc,cd->hwd"}> : () -> ()
    %cst_40 = arith.constant dense<0.000000e+00> : vector<4x32x4xf32>
    %39 = tpu.matmul %36, %38, %cst_40 {dimension_numbers = #tpu.dot_dimension_numbers<[2], [0], [0, 1], [1], [0, 0, 0, 1, 1, 1], [], []>} : vector<4x32x4xf32>, vector<4x4xf32>, vector<4x32x4xf32> -> vector<4x32x4xf32>
    "tpu.trace_stop"() : () -> ()
    %40 = arith.addf %35, %39 : vector<4x32x4xf32>
    %c1_41 = arith.constant 1 : index
    %c0_42 = arith.constant 0 : index
    %c0_43 = arith.constant 0 : index
    %41 = vector.load %arg6[%c1_41, %c0_42, %c0_43] : memref<6x34x4xf32, #tpu.memory_space<vmem>>, vector<4x32x4xf32>
    %c1_44 = arith.constant 1 : index
    %c0_45 = arith.constant 0 : index
    %c0_46 = arith.constant 0 : index
    %c0_47 = arith.constant 0 : index
    %42 = vector.load %arg3[%c1_44, %c0_45, %c0_46, %c0_47] : memref<4x3x4x4xf32, #tpu.memory_space<vmem>>, vector<1x1x4x4xf32>
    %43 = vector.shape_cast %42 : vector<1x1x4x4xf32> to vector<4x4xf32>
    "tpu.trace_start"() <{level = 10 : i32, message = "hwc,cd->hwd"}> : () -> ()
    %cst_48 = arith.constant dense<0.000000e+00> : vector<4x32x4xf32>
    %44 = tpu.matmul %41, %43, %cst_48 {dimension_numbers = #tpu.dot_dimension_numbers<[2], [0], [0, 1], [1], [0, 0, 0, 1, 1, 1], [], []>} : vector<4x32x4xf32>, vector<4x4xf32>, vector<4x32x4xf32> -> vector<4x32x4xf32>
    "tpu.trace_stop"() : () -> ()
    %45 = arith.addf %40, %44 : vector<4x32x4xf32>
    %c1_49 = arith.constant 1 : index
    %c1_50 = arith.constant 1 : index
    %c0_51 = arith.constant 0 : index
    %46 = vector.load %arg6[%c1_49, %c1_50, %c0_51] : memref<6x34x4xf32, #tpu.memory_space<vmem>>, vector<4x32x4xf32>
    %c1_52 = arith.constant 1 : index
    %c1_53 = arith.constant 1 : index
    %c0_54 = arith.constant 0 : index
    %c0_55 = arith.constant 0 : index
    %47 = vector.load %arg3[%c1_52, %c1_53, %c0_54, %c0_55] : memref<4x3x4x4xf32, #tpu.memory_space<vmem>>, vector<1x1x4x4xf32>
    %48 = vector.shape_cast %47 : vector<1x1x4x4xf32> to vector<4x4xf32>
    "tpu.trace_start"() <{level = 10 : i32, message = "hwc,cd->hwd"}> : () -> ()
    %cst_56 = arith.constant dense<0.000000e+00> : vector<4x32x4xf32>
    %49 = tpu.matmul %46, %48, %cst_56 {dimension_numbers = #tpu.dot_dimension_numbers<[2], [0], [0, 1], [1], [0, 0, 0, 1, 1, 1], [], []>} : vector<4x32x4xf32>, vector<4x4xf32>, vector<4x32x4xf32> -> vector<4x32x4xf32>
    "tpu.trace_stop"() : () -> ()
    %50 = arith.addf %45, %49 : vector<4x32x4xf32>
    %c1_57 = arith.constant 1 : index
    %c2_58 = arith.constant 2 : index
    %c0_59 = arith.constant 0 : index
    %51 = vector.load %arg6[%c1_57, %c2_58, %c0_59] : memref<6x34x4xf32, #tpu.memory_space<vmem>>, vector<4x32x4xf32>
    %c1_60 = arith.constant 1 : index
    %c2_61 = arith.constant 2 : index
    %c0_62 = arith.constant 0 : index
    %c0_63 = arith.constant 0 : index
    %52 = vector.load %arg3[%c1_60, %c2_61, %c0_62, %c0_63] : memref<4x3x4x4xf32, #tpu.memory_space<vmem>>, vector<1x1x4x4xf32>
    %53 = vector.shape_cast %52 : vector<1x1x4x4xf32> to vector<4x4xf32>
    "tpu.trace_start"() <{level = 10 : i32, message = "hwc,cd->hwd"}> : () -> ()
    %cst_64 = arith.constant dense<0.000000e+00> : vector<4x32x4xf32>
    %54 = tpu.matmul %51, %53, %cst_64 {dimension_numbers = #tpu.dot_dimension_numbers<[2], [0], [0, 1], [1], [0, 0, 0, 1, 1, 1], [], []>} : vector<4x32x4xf32>, vector<4x4xf32>, vector<4x32x4xf32> -> vector<4x32x4xf32>
    "tpu.trace_stop"() : () -> ()
    %55 = arith.addf %50, %54 : vector<4x32x4xf32>
    %56 = vector.broadcast %26 : vector<1x1x4xf32> to vector<4x32x4xf32>
    %57 = arith.addf %55, %56 : vector<4x32x4xf32>
    %58 = vector.shape_cast %57 : vector<4x32x4xf32> to vector<4x1x32x4xf32>
    %c0_65 = arith.constant 0 : index
    %c0_66 = arith.constant 0 : index
    %c0_67 = arith.constant 0 : index
    %c0_68 = arith.constant 0 : index
    %59 = vector.load %arg7[%c0_65, %c0_66, %c0_67, %c0_68] : memref<4x2x32x4xf32, #tpu.memory_space<vmem>>, vector<4x1x32x4xf32>
    tpu.vector_store %arg7[%c0_65, %c0_66, %c0_67, %c0_68], %58 {strides = array<i32>} : memref<4x2x32x4xf32, #tpu.memory_space<vmem>>, vector<4x1x32x4xf32>,
    %c1_69 = arith.constant 1 : index
    %c0_70 = arith.constant 0 : index
    %c0_71 = arith.constant 0 : index
    %60 = vector.load %arg6[%c1_69, %c0_70, %c0_71] : memref<6x34x4xf32, #tpu.memory_space<vmem>>, vector<4x32x4xf32>
    %c2_72 = arith.constant 2 : index
    %c0_73 = arith.constant 0 : index
    %c0_74 = arith.constant 0 : index
    %c0_75 = arith.constant 0 : index
    %61 = vector.load %arg3[%c2_72, %c0_73, %c0_74, %c0_75] : memref<4x3x4x4xf32, #tpu.memory_space<vmem>>, vector<1x1x4x4xf32>
    %62 = vector.shape_cast %61 : vector<1x1x4x4xf32> to vector<4x4xf32>
    "tpu.trace_start"() <{level = 10 : i32, message = "hwc,cd->hwd"}> : () -> ()
    %cst_76 = arith.constant dense<0.000000e+00> : vector<4x32x4xf32>
    %63 = tpu.matmul %60, %62, %cst_76 {dimension_numbers = #tpu.dot_dimension_numbers<[2], [0], [0, 1], [1], [0, 0, 0, 1, 1, 1], [], []>} : vector<4x32x4xf32>, vector<4x4xf32>, vector<4x32x4xf32> -> vector<4x32x4xf32>
    "tpu.trace_stop"() : () -> ()
    %c1_77 = arith.constant 1 : index
    %c1_78 = arith.constant 1 : index
    %c0_79 = arith.constant 0 : index
    %64 = vector.load %arg6[%c1_77, %c1_78, %c0_79] : memref<6x34x4xf32, #tpu.memory_space<vmem>>, vector<4x32x4xf32>
    %c2_80 = arith.constant 2 : index
    %c1_81 = arith.constant 1 : index
    %c0_82 = arith.constant 0 : index
    %c0_83 = arith.constant 0 : index
    %65 = vector.load %arg3[%c2_80, %c1_81, %c0_82, %c0_83] : memref<4x3x4x4xf32, #tpu.memory_space<vmem>>, vector<1x1x4x4xf32>
    %66 = vector.shape_cast %65 : vector<1x1x4x4xf32> to vector<4x4xf32>
    "tpu.trace_start"() <{level = 10 : i32, message = "hwc,cd->hwd"}> : () -> ()
    %cst_84 = arith.constant dense<0.000000e+00> : vector<4x32x4xf32>
    %67 = tpu.matmul %64, %66, %cst_84 {dimension_numbers = #tpu.dot_dimension_numbers<[2], [0], [0, 1], [1], [0, 0, 0, 1, 1, 1], [], []>} : vector<4x32x4xf32>, vector<4x4xf32>, vector<4x32x4xf32> -> vector<4x32x4xf32>
    "tpu.trace_stop"() : () -> ()
    %68 = arith.addf %63, %67 : vector<4x32x4xf32>
    %c1_85 = arith.constant 1 : index
    %c2_86 = arith.constant 2 : index
    %c0_87 = arith.constant 0 : index
    %69 = vector.load %arg6[%c1_85, %c2_86, %c0_87] : memref<6x34x4xf32, #tpu.memory_space<vmem>>, vector<4x32x4xf32>
    %c2_88 = arith.constant 2 : index
    %c2_89 = arith.constant 2 : index
    %c0_90 = arith.constant 0 : index
    %c0_91 = arith.constant 0 : index
    %70 = vector.load %arg3[%c2_88, %c2_89, %c0_90, %c0_91] : memref<4x3x4x4xf32, #tpu.memory_space<vmem>>, vector<1x1x4x4xf32>
    %71 = vector.shape_cast %70 : vector<1x1x4x4xf32> to vector<4x4xf32>
    "tpu.trace_start"() <{level = 10 : i32, message = "hwc,cd->hwd"}> : () -> ()
    %cst_92 = arith.constant dense<0.000000e+00> : vector<4x32x4xf32>
    %72 = tpu.matmul %69, %71, %cst_92 {dimension_numbers = #tpu.dot_dimension_numbers<[2], [0], [0, 1], [1], [0, 0, 0, 1, 1, 1], [], []>} : vector<4x32x4xf32>, vector<4x4xf32>, vector<4x32x4xf32> -> vector<4x32x4xf32>
    "tpu.trace_stop"() : () -> ()
    %73 = arith.addf %68, %72 : vector<4x32x4xf32>
    %c2_93 = arith.constant 2 : index
    %c0_94 = arith.constant 0 : index
    %c0_95 = arith.constant 0 : index
    %74 = vector.load %arg6[%c2_93, %c0_94, %c0_95] : memref<6x34x4xf32, #tpu.memory_space<vmem>>, vector<4x32x4xf32>
    %c3 = arith.constant 3 : index
    %c0_96 = arith.constant 0 : index
    %c0_97 = arith.constant 0 : index
    %c0_98 = arith.constant 0 : index
    %75 = vector.load %arg3[%c3, %c0_96, %c0_97, %c0_98] : memref<4x3x4x4xf32, #tpu.memory_space<vmem>>, vector<1x1x4x4xf32>
    %76 = vector.shape_cast %75 : vector<1x1x4x4xf32> to vector<4x4xf32>
    "tpu.trace_start"() <{level = 10 : i32, message = "hwc,cd->hwd"}> : () -> ()
    %cst_99 = arith.constant dense<0.000000e+00> : vector<4x32x4xf32>
    %77 = tpu.matmul %74, %76, %cst_99 {dimension_numbers = #tpu.dot_dimension_numbers<[2], [0], [0, 1], [1], [0, 0, 0, 1, 1, 1], [], []>} : vector<4x32x4xf32>, vector<4x4xf32>, vector<4x32x4xf32> -> vector<4x32x4xf32>
    "tpu.trace_stop"() : () -> ()
    %78 = arith.addf %73, %77 : vector<4x32x4xf32>
    %c2_100 = arith.constant 2 : index
    %c1_101 = arith.constant 1 : index
    %c0_102 = arith.constant 0 : index
    %79 = vector.load %arg6[%c2_100, %c1_101, %c0_102] : memref<6x34x4xf32, #tpu.memory_space<vmem>>, vector<4x32x4xf32>
    %c3_103 = arith.constant 3 : index
    %c1_104 = arith.constant 1 : index
    %c0_105 = arith.constant 0 : index
    %c0_106 = arith.constant 0 : index
    %80 = vector.load %arg3[%c3_103, %c1_104, %c0_105, %c0_106] : memref<4x3x4x4xf32, #tpu.memory_space<vmem>>, vector<1x1x4x4xf32>
    %81 = vector.shape_cast %80 : vector<1x1x4x4xf32> to vector<4x4xf32>
    "tpu.trace_start"() <{level = 10 : i32, message = "hwc,cd->hwd"}> : () -> ()
    %cst_107 = arith.constant dense<0.000000e+00> : vector<4x32x4xf32>
    %82 = tpu.matmul %79, %81, %cst_107 {dimension_numbers = #tpu.dot_dimension_numbers<[2], [0], [0, 1], [1], [0, 0, 0, 1, 1, 1], [], []>} : vector<4x32x4xf32>, vector<4x4xf32>, vector<4x32x4xf32> -> vector<4x32x4xf32>
    "tpu.trace_stop"() : () -> ()
    %83 = arith.addf %78, %82 : vector<4x32x4xf32>
    %c2_108 = arith.constant 2 : index
    %c2_109 = arith.constant 2 : index
    %c0_110 = arith.constant 0 : index
    %84 = vector.load %arg6[%c2_108, %c2_109, %c0_110] : memref<6x34x4xf32, #tpu.memory_space<vmem>>, vector<4x32x4xf32>
    %c3_111 = arith.constant 3 : index
    %c2_112 = arith.constant 2 : index
    %c0_113 = arith.constant 0 : index
    %c0_114 = arith.constant 0 : index
    %85 = vector.load %arg3[%c3_111, %c2_112, %c0_113, %c0_114] : memref<4x3x4x4xf32, #tpu.memory_space<vmem>>, vector<1x1x4x4xf32>
    %86 = vector.shape_cast %85 : vector<1x1x4x4xf32> to vector<4x4xf32>
    "tpu.trace_start"() <{level = 10 : i32, message = "hwc,cd->hwd"}> : () -> ()
    %cst_115 = arith.constant dense<0.000000e+00> : vector<4x32x4xf32>
    %87 = tpu.matmul %84, %86, %cst_115 {dimension_numbers = #tpu.dot_dimension_numbers<[2], [0], [0, 1], [1], [0, 0, 0, 1, 1, 1], [], []>} : vector<4x32x4xf32>, vector<4x4xf32>, vector<4x32x4xf32> -> vector<4x32x4xf32>
    "tpu.trace_stop"() : () -> ()
    %88 = arith.addf %83, %87 : vector<4x32x4xf32>
    %89 = vector.broadcast %26 : vector<1x1x4xf32> to vector<4x32x4xf32>
    %90 = arith.addf %88, %89 : vector<4x32x4xf32>
    %91 = vector.shape_cast %90 : vector<4x32x4xf32> to vector<4x1x32x4xf32>
    %c0_116 = arith.constant 0 : index
    %c1_117 = arith.constant 1 : index
    %c0_118 = arith.constant 0 : index
    %c0_119 = arith.constant 0 : index
    %92 = vector.load %arg7[%c0_116, %c1_117, %c0_118, %c0_119] : memref<4x2x32x4xf32, #tpu.memory_space<vmem>>, vector<4x1x32x4xf32>
    tpu.vector_store %arg7[%c0_116, %c1_117, %c0_118, %c0_119], %91 {strides = array<i32>} : memref<4x2x32x4xf32, #tpu.memory_space<vmem>>, vector<4x1x32x4xf32>,
    %c0_120 = arith.constant 0 : index
    %c0_121 = arith.constant 0 : index
    %c0_122 = arith.constant 0 : index
    %c0_123 = arith.constant 0 : index
    %93 = vector.load %arg7[%c0_120, %c0_121, %c0_122, %c0_123] : memref<4x2x32x4xf32, #tpu.memory_space<vmem>>, vector<4x2x32x4xf32>
    %94 = vector.shape_cast %93 : vector<4x2x32x4xf32> to vector<8x32x4xf32>
    %c0_124 = arith.constant 0 : index
    %c0_125 = arith.constant 0 : index
    %c0_126 = arith.constant 0 : index
    %c0_127 = arith.constant 0 : index
    %95 = vector.load %arg5[%c0_124, %c0_125, %c0_126, %c0_127] : memref<1x8x32x4xf32, #tpu.memory_space<vmem>>, vector<1x8x32x4xf32>
    %96 = vector.shape_cast %95 : vector<1x8x32x4xf32> to vector<8x32x4xf32>
    %97 = vector.shape_cast %94 : vector<8x32x4xf32> to vector<1x8x32x4xf32>
    tpu.vector_store %arg5[%c0_124, %c0_125, %c0_126, %c0_127], %97 {strides = array<i32>} : memref<1x8x32x4xf32, #tpu.memory_space<vmem>>, vector<1x8x32x4xf32>,
    return
  }
  func.func @transform_0(%arg0: i32, %arg1: i32) -> (i32, i32, i32, i32) {
    %c0_i32 = arith.constant 0 : i32
    %c0_i32_0 = arith.constant 0 : i32
    %c0_i32_1 = arith.constant 0 : i32
    %c0_i32_2 = arith.constant 0 : i32
    return %arg0, %c0_i32, %c0_i32_0, %c0_i32_1 : i32, i32, i32, i32
  }
  func.func @transform_1(%arg0: i32, %arg1: i32) -> (i32, i32, i32, i32) {
    %c0_i32 = arith.constant 0 : i32
    %c0_i32_0 = arith.constant 0 : i32
    %c0_i32_1 = arith.constant 0 : i32
    %c0_i32_2 = arith.constant 0 : i32
    %c0_i32_3 = arith.constant 0 : i32
    return %c0_i32, %c0_i32_0, %c0_i32_1, %c0_i32_2 : i32, i32, i32, i32
  }
  func.func @transform_2(%arg0: i32, %arg1: i32) -> (i32, i32) {
    %c0_i32 = arith.constant 0 : i32
    %c0_i32_0 = arith.constant 0 : i32
    %c0_i32_1 = arith.constant 0 : i32
    return %c0_i32, %c0_i32_0 : i32, i32
  }
  func.func @transform_3(%arg0: i32, %arg1: i32) -> (i32, i32, i32, i32) {
    %c0_i32 = arith.constant 0 : i32
    %c0_i32_0 = arith.constant 0 : i32
    %c0_i32_1 = arith.constant 0 : i32
    return %arg0, %arg1, %c0_i32, %c0_i32_0 : i32, i32, i32, i32
  }
}

</mosaic_0001>

<bundles_post_ra>
// kernel: tpu_custom_call.1
= control target key start
LH: loop header
LB: loop body
LE: loop exit
PB: predicated region body
PF: predicated region fallthrough
CT: control target
= control target key end

     0   :  { %s5659_s12 = smov 0   ;;  %s5661_s13 = smov 0   ;;  %s6669_s0 = inlined_call_operand.vmem [shape: f32[2,16,16,4], index: 0, kind: input, shape index: {}]   ;;  %s6670_s1 = inlined_call_operand.vmem [shape: f32[4,3,4,4], index: 1, kind: input, shape index: {}]   ;;  %s6671_s2 = inlined_call_operand.vmem [shape: f32[1,4], index: 2, kind: input, shape index: {}]   ;;  %s6672_s3 = inlined_call_operand.vmem [shape: f32[2,32,32,4], index: 3, kind: output, shape index: {}]  }
   0x1   :  { %s5663_s14 = smov 0   ;;  %s5665_s15 = smov 0  }
   0x2   :  { %s5667_s16 = smov 0  }
   0x3 LB: > { %s22_s17 = sadd.s32 1, %s5624_s14  ;;  %s25_s18 = sadd.s32 1, %s5628_s15  ;;  %s5632_s16 = sphi %s5667_s16, %s13_s16   ;;  %s5628_s15 = sphi %s5665_s15, %s6676_s15   ;;  %s5624_s14 = sphi %s5663_s14, %s6675_s14   ;;  %s5620_s13 = sphi %s5661_s13, %s6674_s13   ;;  %s5616_s12 = sphi %s5659_s12, %s6673_s12  }
   0x4   : > { %p23_p0 = scmp.ge.s32.totalorder %s22_s17, 4  ;;  %p4633_p1 = scmp.ge.s32.totalorder %s5632_s16, 1 }
   0x5   : > { %p151_p2 = scmp.lt.s32.totalorder %s5632_s16, 9 }
   0x6   : > { %s6678_s17 = smov (%p23_p0, %s22_s17), 0  ;;  %s6680_s18 = smov (!%p23_p0, %s25_s18), %s5628_s15 }
   0x7   : > { %p152_p3 = pnand %p4633_p1, %p151_p2  ;;  %p27_p4 = scmp.ge.s32.totalorder %s6680_s18, 2 }
   0x8   : > { %s4640_s19 = sshll.u32 (!%p152_p3), %s5616_s12, 2  ;;  %vm197_vm0 = vcmask (!%p152_p3), 24576   ;;  %p180_p5 = scmp.lt.s32.totalorder (!%p152_p3), %s5620_s13, 1  ;;  %v232_v0 = vlaneseq (!%p152_p3)  ;;  %v5634_v1 = vmov (!%p152_p3), 0.0   ;;  %v5635_v2 = vmov (!%p152_p3), 1966171168  }
   0x9   : > { %s6682_s18 = smov (%p27_p4, %s6680_s18), 0  ;;  %155 = sbr.rel (%p152_p3) target bundleno = 577 (0x241), region = 32 }
   0xa   : > { %198 = vst.msk [vmem:[#allocation2] sm:$0x1] (!%p152_p3), %vm197_vm0, %v5634_v1  ;;  %199 = vst.msk [vmem:[#allocation2 + $0x28] sm:$0x1] (!%p152_p3), %vm197_vm0, %v5634_v1  ;;  %s4636_s20 = sshll.u32 (!%p152_p3), %s5616_s12, 3  ;;  %v230_v3 = vunpack.c.l.s4 (!%p152_p3), %v5635_v2  ;;  %v233_v4 = vshrl.u32 (!%p152_p3), %v232_v0, 7 }
   0xb   : > { %200 = vst.msk [vmem:[#allocation2 + $0x50] sm:$0x1] (!%p152_p3), %vm197_vm0, %v5634_v1  ;;  %201 = vst.msk [vmem:[#allocation2 + $0x78] sm:$0x1] (!%p152_p3), %vm197_vm0, %v5634_v1  ;;  %v5636_v5 = vmov (!%p152_p3), 1983009808  }
   0xc   : > { %202 = vst.msk [vmem:[#allocation2 + $0xa0] sm:$0x1] (!%p152_p3), %vm197_vm0, %v5634_v1  ;;  %203 = vst.msk [vmem:[#allocation2 + $0xc8] sm:$0x1] (!%p152_p3), %vm197_vm0, %v5634_v1  ;;  %v879_v6 = vunpack.c.l.s4 (!%p152_p3), %v5636_v5  ;;  %p188_p6 = scmp.lt.s32.totalorder (!%p152_p3), %s4636_s20, 31  ;;  %v231_v7 = vunpack.c.0.s8 (!%p152_p3), %v230_v3  ;;  %s4871_s22 = sshll.u32 (!%p152_p3), %s5616_s12, 6 }
   0xd   : > { %204 = vst.msk [vmem:[#allocation2 + $0x21] sm:$0x1] (!%p152_p3), %vm197_vm0, %v5634_v1  ;;  %205 = vst.msk [vmem:[#allocation2 + $0x49] sm:$0x1] (!%p152_p3), %vm197_vm0, %v5634_v1  ;;  %v5711_v11 = vsub.s32 (!%p152_p3), 0, %v233_v4  ;;  %vm1165_vm1 = vcmask (!%p152_p3), 31744  }
   0xe   : > { %206 = vst.msk [vmem:[#allocation2 + $0x71] sm:$0x1] (!%p152_p3), %vm197_vm0, %v5634_v1  ;;  %207 = vst.msk [vmem:[#allocation2 + $0x99] sm:$0x1] (!%p152_p3), %vm197_vm0, %v5634_v1  ;;  %v880_v8 = vunpack.c.0.s8 (!%p152_p3), %v879_v6  ;;  %v5705_v9 = vsub.s32 (!%p152_p3), %v231_v7, %v233_v4  ;;  %p4642_p7 = scmp.ne.s32.totalorder (!%p152_p3), %s5616_s12, 0 }
   0xf   : > { %208 = vst.msk [vmem:[#allocation2 + $0xc1] sm:$0x1] (!%p152_p3), %vm197_vm0, %v5634_v1  ;;  %209 = vst.msk [vmem:[#allocation2 + $0xe9] sm:$0x1] (!%p152_p3), %vm197_vm0, %v5634_v1 }
  0x10   : > { %s6684_s13 = smov (!%p180_p5, %s5620_s13), 1  ;;  %s6686_s20 = smov (!%p188_p6, %s4636_s20), 31  ;;  %v5713_v12 = vsub.s32 %v880_v8, %v233_v4 }
  0x11   : > { %s4870_s21 = sshll.u32 %s6684_s13, 8  ;;  %s4638_s26 = sshll.u32 %s6684_s13, 7 }
  0x12   : > { %s5703_s25 = scalar_lea.vmem %s6669_s0, %s4870_s21  ;;  %s4637_s28 = sshll.u32 %s6686_s20, 2 }
  0x13   : > { %s5708_s27 = scalar_lea.vmem %s5703_s25, %s4871_s22  ;;  %s192_s29 = sadd.s32 %s4638_s26, %s4637_s28 }
  0x14   : > { %v212_v10 = vld [vmem:[%s5708_s27] sm:$0xff]  ;;  %v213_v13 = vld [vmem:[%s5708_s27 + $0x8] sm:$0xff]  ;;  %v5717_v14 = vld [vmem:[%s5708_s27 + $0x10] sm:$0xff]  ;;  %s4639_s30 = sshll.u32 %s192_s29, 3 }
  0x15   : > { %v235_v15 = vrot.slane %v212_v10, %v5705_v9  ;;  %v228_v16 = vcombine.high %v212_v10, %v212_v10  ;;  %v284_v17 = vrot.slane %v213_v13, %v5705_v9  ;;  %v277_v18 = vcombine.high %v213_v13, %v213_v13  ;;  %v5722_v19 = vld [vmem:[%s5708_s27 + $0x18] sm:$0xff]  ;;  %s5737_s6 = scalar_lea.vmem %s6672_s3, %s4639_s30 }
  0x16   : > { %v333_v20 = vrot.slane %v5717_v14, %v5705_v9  ;;  %v326_v21 = vcombine.high %v5717_v14, %v5717_v14  ;;  %v5730_v22 = vrot.slane %v5722_v19, %v5705_v9  ;;  %v375_v23 = vcombine.high %v5722_v19, %v5722_v19 }
  0x17   : > { %v243_v24 = vcombine.high %v235_v15, %v235_v15  ;;  %v251_v25 = vrot.slane %v235_v15, %v5705_v9  ;;  %v242_v26 = vrot.slane %v228_v16, %v5705_v9  ;;  %v292_v27 = vcombine.high %v284_v17, %v284_v17 }
  0x18   : > { %v300_v28 = vrot.slane %v284_v17, %v5705_v9  ;;  %v291_v29 = vrot.slane %v277_v18, %v5705_v9  ;;  %v341_v30 = vcombine.high %v333_v20, %v333_v20  ;;  %v349_v31 = vrot.slane %v333_v20, %v5705_v9 }
  0x19   : > { %v265_v32 = vrot.slane %v243_v24, %v5705_v9  ;;  %v273_v33 = vcombine.high %v251_v25, %v251_v25  ;;  %v623_v34 = vrot.slane %v251_v25, %v5711_v11  ;;  %v244_v35 = vcombine.high %v242_v26, %v242_v26 }
  0x1a   : > { %v258_v36 = vrot.slane %v242_v26, %v5705_v9  ;;  %v314_v37 = vrot.slane %v292_v27, %v5705_v9  ;;  %v322_v38 = vcombine.high %v300_v28, %v300_v28  ;;  %v655_v39 = vrot.slane %v300_v28, %v5711_v11 }
  0x1b   : > { %v275_v40 = vcombine.high %v265_v32, %v265_v32  ;;  %v627_v41 = vrot.slane %v265_v32, %v5711_v11  ;;  %v631_v42 = vrot.slane %v273_v33, %v5711_v11  ;;  %v272_v43 = vrot.slane %v244_v35, %v5705_v9 }
  0x1c   : > { %v274_v44 = vcombine.high %v258_v36, %v258_v36  ;;  %v639_v45 = vrot.slane %v258_v36, %v5711_v11  ;;  %v324_v46 = vcombine.high %v314_v37, %v314_v37  ;;  %v659_v47 = vrot.slane %v314_v37, %v5711_v11 }
  0x1d   : > { %v635_v48 = vrot.slane %v275_v40, %v5711_v11  ;;  %v876_v49 = vcombine.low %v623_v34, %v627_v41  ;;  %v276_v50 = vcombine.high %v272_v43, %v272_v43  ;;  %v643_v51 = vrot.slane %v272_v43, %v5711_v11 }
  0x1e   : > { %v647_v52 = vrot.slane %v274_v44, %v5711_v11  ;;  %v663_v53 = vrot.slane %v322_v38, %v5711_v11  ;;  %v667_v54 = vrot.slane %v324_v46, %v5711_v11  ;;  %v910_v55 = vcombine.low %v655_v39, %v659_v47 }
  0x1f   : > { %v877_v56 = vcombine.low %v631_v42, %v635_v48  ;;  %v884_v57 = vrot.slane %v876_v49, %v5713_v12  ;;  %v651_v58 = vrot.slane %v276_v50, %v5711_v11  ;;  %v893_v59 = vcombine.low %v639_v45, %v643_v51  ;;  %v216_v51 = vld [vmem:[%s5708_s27 + $0x20] sm:$0xff] }
  0x20   : > { %v911_v60 = vcombine.low %v663_v53, %v667_v54  ;;  %v918_v61 = vrot.slane %v910_v55, %v5713_v12  ;;  %v293_v62 = vcombine.high %v291_v29, %v291_v29  ;;  %v307_v63 = vrot.slane %v291_v29, %v5705_v9 }
  0x21   : > { %v891_v0 = vrot.slane %v877_v56, %v5713_v12  ;;  %v894_v1 = vcombine.low %v647_v52, %v651_v58  ;;  %v901_v2 = vrot.slane %v893_v59, %v5713_v12  ;;  %v363_v3 = vrot.slane %v341_v30, %v5705_v9 }
  0x22   : > { %v925_v4 = vrot.slane %v911_v60, %v5713_v12  ;;  %v321_v5 = vrot.slane %v293_v62, %v5705_v9  ;;  %v323_v6 = vcombine.high %v307_v63, %v307_v63  ;;  %v671_v7 = vrot.slane %v307_v63, %v5711_v11 }
  0x23   : > { %v892_v8 = vcombine.low %v884_v57, %v891_v0  ;;  %v908_v10 = vrot.slane %v894_v1, %v5713_v12  ;;  %v371_v13 = vcombine.high %v349_v31, %v349_v31  ;;  %v373_v15 = vcombine.high %v363_v3, %v363_v3 }
  0x24   : > { %v926_v16 = vcombine.low %v918_v61, %v925_v4  ;;  %v325_v17 = vcombine.high %v321_v5, %v321_v5  ;;  %v675_v18 = vrot.slane %v321_v5, %v5711_v11  ;;  %v679_v20 = vrot.slane %v323_v6, %v5711_v11 }
  0x25   : > { %1166 = vst.msk [vmem:[#allocation2 + $0x29] sm:$0xff] %vm1165_vm1, %v892_v8  ;;  %v909_v24 = vcombine.low %v901_v2, %v908_v10  ;;  %v687_v25 = vrot.slane %v349_v31, %v5711_v11  ;;  %v691_v26 = vrot.slane %v363_v3, %v5711_v11  ;;  %v695_v27 = vrot.slane %v371_v13, %v5711_v11 }
  0x26   : > { %1168 = vst.msk [vmem:[#allocation2 + $0x39] sm:$0xff] %vm1165_vm1, %v926_v16  ;;  %v683_v28 = vrot.slane %v325_v17, %v5711_v11  ;;  %v927_v29 = vcombine.low %v671_v7, %v675_v18  ;;  %v699_v30 = vrot.slane %v373_v15, %v5711_v11  ;;  %v340_v32 = vrot.slane %v326_v21, %v5705_v9 }
  0x27   : > { %1167 = vst.msk [vmem:[#allocation2 + $0x31] sm:$0xff] %vm1165_vm1, %v909_v24  ;;  %v944_v33 = vcombine.low %v687_v25, %v691_v26  ;;  %v390_v31 = vcombine.high %v5730_v22, %v5730_v22  ;;  %v398_v34 = vrot.slane %v5730_v22, %v5705_v9  ;;  %v389_v35 = vrot.slane %v375_v23, %v5705_v9 }
  0x28   : > { %v928_v36 = vcombine.low %v679_v20, %v683_v28  ;;  %v935_v37 = vrot.slane %v927_v29, %v5713_v12  ;;  %v945_v38 = vcombine.low %v695_v27, %v699_v30  ;;  %v342_v14 = vcombine.high %v340_v32, %v340_v32  ;;  %v217_v28 = vld [vmem:[%s5708_s27 + $0x28] sm:$0xff] }
  0x29   : > { %v952_v21 = vrot.slane %v944_v33, %v5713_v12  ;;  %v356_v39 = vrot.slane %v340_v32, %v5705_v9  ;;  %v412_v40 = vrot.slane %v390_v31, %v5705_v9  ;;  %v420_v41 = vcombine.high %v398_v34, %v398_v34 }
  0x2a   : > { %v942_v22 = vrot.slane %v928_v36, %v5713_v12  ;;  %v959_v42 = vrot.slane %v945_v38, %v5713_v12  ;;  %v370_v19 = vrot.slane %v342_v14, %v5705_v9  ;;  %v719_v23 = vrot.slane %v398_v34, %v5711_v11 }
  0x2b   : > { %v372_v43 = vcombine.high %v356_v39, %v356_v39  ;;  %v703_v44 = vrot.slane %v356_v39, %v5711_v11  ;;  %v422_v45 = vcombine.high %v412_v40, %v412_v40  ;;  %v723_v46 = vrot.slane %v412_v40, %v5711_v11 }
  0x2c   : > { %v943_v47 = vcombine.low %v935_v37, %v942_v22  ;;  %v960_v48 = vcombine.low %v952_v21, %v959_v42  ;;  %v374_v49 = vcombine.high %v370_v19, %v370_v19  ;;  %v707_v50 = vrot.slane %v370_v19, %v5711_v11 }
  0x2d   : > { %v711_v52 = vrot.slane %v372_v43, %v5711_v11  ;;  %v727_v53 = vrot.slane %v420_v41, %v5711_v11  ;;  %v731_v54 = vrot.slane %v422_v45, %v5711_v11  ;;  %v978_v55 = vcombine.low %v719_v23, %v723_v46 }
  0x2e   : > { %1169 = vst.msk [vmem:[#allocation2 + $0x41] sm:$0xff] %vm1165_vm1, %v943_v47  ;;  %1170 = vst.msk [vmem:[#allocation2 + $0x51] sm:$0xff] %vm1165_vm1, %v960_v48  ;;  %v715_v56 = vrot.slane %v374_v49, %v5711_v11  ;;  %v961_v57 = vcombine.low %v703_v44, %v707_v50  ;;  %v391_v58 = vcombine.high %v389_v35, %v389_v35 }
  0x2f   : > { %v405_v59 = vrot.slane %v389_v35, %v5705_v9  ;;  %v979_v60 = vcombine.low %v727_v53, %v731_v54  ;;  %v986_v61 = vrot.slane %v978_v55, %v5713_v12  ;;  %v431_v62 = vrot.slane %v216_v51, %v5705_v9 }
  0x30   : > { %v424_v63 = vcombine.high %v216_v51, %v216_v51  ;;  %v962_v0 = vcombine.low %v711_v52, %v715_v56  ;;  %v969_v1 = vrot.slane %v961_v57, %v5713_v12  ;;  %v419_v2 = vrot.slane %v391_v58, %v5705_v9  ;;  %v218_v52 = vld [vmem:[%s5708_s27 + $0x30] sm:$0xff] }
  0x31   : > { %v421_v3 = vcombine.high %v405_v59, %v405_v59  ;;  %v993_v4 = vrot.slane %v979_v60, %v5713_v12  ;;  %v735_v5 = vrot.slane %v405_v59, %v5711_v11  ;;  %v439_v6 = vcombine.high %v431_v62, %v431_v62 }
  0x32   : > { %v447_v7 = vrot.slane %v431_v62, %v5705_v9  ;;  %v976_v8 = vrot.slane %v962_v0, %v5713_v12  ;;  %v423_v10 = vcombine.high %v419_v2, %v419_v2  ;;  %v739_v13 = vrot.slane %v419_v2, %v5711_v11 }
  0x33   : > { %v743_v15 = vrot.slane %v421_v3, %v5711_v11  ;;  %v994_v16 = vcombine.low %v986_v61, %v993_v4  ;;  %v461_v17 = vrot.slane %v439_v6, %v5705_v9  ;;  %v438_v27 = vrot.slane %v424_v63, %v5705_v9 }
  0x34   : > { %v469_v18 = vcombine.high %v447_v7, %v447_v7  ;;  %v751_v20 = vrot.slane %v447_v7, %v5711_v11  ;;  %v977_v24 = vcombine.low %v969_v1, %v976_v8  ;;  %v747_v25 = vrot.slane %v423_v10, %v5711_v11 }
  0x35   : > { %v995_v26 = vcombine.low %v735_v5, %v739_v13  ;;  %1172 = vst.msk [vmem:[#allocation2 + $0x61] sm:$0xff] %vm1165_vm1, %v994_v16  ;;  %v471_v29 = vcombine.high %v461_v17, %v461_v17  ;;  %v755_v30 = vrot.slane %v461_v17, %v5711_v11  ;;  %v480_v33 = vrot.slane %v217_v28, %v5705_v9 }
  0x36   : > { %v759_v32 = vrot.slane %v469_v18, %v5711_v11  ;;  %1171 = vst.msk [vmem:[#allocation2 + $0x59] sm:$0xff] %vm1165_vm1, %v977_v24  ;;  %v996_v31 = vcombine.low %v743_v15, %v747_v25  ;;  %v440_v35 = vcombine.high %v438_v27, %v438_v27  ;;  %v454_v36 = vrot.slane %v438_v27, %v5705_v9 }
  0x37   : > { %v1003_v34 = vrot.slane %v995_v26, %v5713_v12  ;;  %v763_v37 = vrot.slane %v471_v29, %v5711_v11  ;;  %v1012_v38 = vcombine.low %v751_v20, %v755_v30  ;;  %v488_v14 = vcombine.high %v480_v33, %v480_v33  ;;  %v219_v29 = vld [vmem:[%s5708_s27 + $0x38] sm:$0xff] }
  0x38   : > { %v496_v21 = vrot.slane %v480_v33, %v5705_v9  ;;  %v1010_v39 = vrot.slane %v996_v31, %v5713_v12  ;;  %v468_v40 = vrot.slane %v440_v35, %v5705_v9  ;;  %v470_v41 = vcombine.high %v454_v36, %v454_v36 }
  0x39   : > { %v767_v22 = vrot.slane %v454_v36, %v5711_v11  ;;  %v1013_v42 = vcombine.low %v759_v32, %v763_v37  ;;  %v1020_v19 = vrot.slane %v1012_v38, %v5713_v12  ;;  %v510_v23 = vrot.slane %v488_v14, %v5705_v9 }
  0x3a   : > { %v518_v43 = vcombine.high %v496_v21, %v496_v21  ;;  %v1011_v44 = vcombine.low %v1003_v34, %v1010_v39  ;;  %v472_v45 = vcombine.high %v468_v40, %v468_v40  ;;  %v771_v46 = vrot.slane %v468_v40, %v5711_v11 }
  0x3b   : > { %v775_v47 = vrot.slane %v470_v41, %v5711_v11  ;;  %v1027_v48 = vrot.slane %v1013_v42, %v5713_v12  ;;  %v520_v49 = vcombine.high %v510_v23, %v510_v23  ;;  %v783_v50 = vrot.slane %v496_v21, %v5711_v11 }
  0x3c   : > { %v787_v51 = vrot.slane %v510_v23, %v5711_v11  ;;  %1173 = vst.msk [vmem:[#allocation2 + $0x69] sm:$0xff] %vm1165_vm1, %v1011_v44  ;;  %v779_v53 = vrot.slane %v472_v45, %v5711_v11  ;;  %v1029_v54 = vcombine.low %v767_v22, %v771_v46  ;;  %v791_v55 = vrot.slane %v518_v43, %v5711_v11 }
  0x3d   : > { %v473_v56 = vcombine.high %v217_v28, %v217_v28  ;;  %v1028_v57 = vcombine.low %v1020_v19, %v1027_v48  ;;  %v795_v58 = vrot.slane %v520_v49, %v5711_v11  ;;  %v529_v60 = vrot.slane %v218_v52, %v5705_v9 }
  0x3e   : > { %v1046_v59 = vcombine.low %v783_v50, %v787_v51  ;;  %v1030_v61 = vcombine.low %v775_v47, %v779_v53  ;;  %v1037_v62 = vrot.slane %v1029_v54, %v5713_v12  ;;  %v522_v0 = vcombine.high %v218_v52, %v218_v52 }
  0x3f   : > { %v487_v63 = vrot.slane %v473_v56, %v5705_v9  ;;  %1174 = vst.msk [vmem:[#allocation2 + $0x79] sm:$0xff] %vm1165_vm1, %v1028_v57  ;;  %v1047_v1 = vcombine.low %v791_v55, %v795_v58  ;;  %v537_v3 = vcombine.high %v529_v60, %v529_v60  ;;  %v545_v4 = vrot.slane %v529_v60, %v5705_v9 }
  0x40   : > { %v1054_v2 = vrot.slane %v1046_v59, %v5713_v12  ;;  %v1044_v5 = vrot.slane %v1030_v61, %v5713_v12  ;;  %v536_v8 = vrot.slane %v522_v0, %v5705_v9  ;;  %v578_v37 = vrot.slane %v219_v29, %v5705_v9 }
  0x41   : > { %v489_v6 = vcombine.high %v487_v63, %v487_v63  ;;  %v503_v7 = vrot.slane %v487_v63, %v5705_v9  ;;  %v1061_v10 = vrot.slane %v1047_v1, %v5713_v12  ;;  %v559_v13 = vrot.slane %v537_v3, %v5705_v9 }
  0x42   : > { %v567_v15 = vcombine.high %v545_v4, %v545_v4  ;;  %v815_v16 = vrot.slane %v545_v4, %v5711_v11  ;;  %v1045_v17 = vcombine.low %v1037_v62, %v1044_v5  ;;  %v538_v31 = vcombine.high %v536_v8, %v536_v8 }
  0x43   : > { %v517_v18 = vrot.slane %v489_v6, %v5705_v9  ;;  %v519_v20 = vcombine.high %v503_v7, %v503_v7  ;;  %v799_v24 = vrot.slane %v503_v7, %v5711_v11  ;;  %v1062_v25 = vcombine.low %v1054_v2, %v1061_v10 }
  0x44   : > { %v569_v26 = vcombine.high %v559_v13, %v559_v13  ;;  %v819_v27 = vrot.slane %v559_v13, %v5711_v11  ;;  %v823_v28 = vrot.slane %v567_v15, %v5711_v11  ;;  %1175 = vst.msk [vmem:[#allocation2 + $0x81] sm:$0xff] %vm1165_vm1, %v1045_v17  ;;  %v552_v36 = vrot.slane %v536_v8, %v5705_v9 }
  0x45   : > { %v521_v30 = vcombine.high %v517_v18, %v517_v18  ;;  %v803_v32 = vrot.slane %v517_v18, %v5711_v11  ;;  %v807_v33 = vrot.slane %v519_v20, %v5711_v11  ;;  %1176 = vst.msk [vmem:[#allocation2 + $0x89] sm:$0xff] %vm1165_vm1, %v1062_v25  ;;  %v566_v21 = vrot.slane %v538_v31, %v5705_v9 }
  0x46   : > { %v827_v34 = vrot.slane %v569_v26, %v5711_v11  ;;  %v1080_v35 = vcombine.low %v815_v16, %v819_v27  ;;  %v571_v39 = vcombine.high %v219_v29, %v219_v29  ;;  %v568_v22 = vcombine.high %v552_v36, %v552_v36 }
  0x47   : > { %v811_v38 = vrot.slane %v521_v30, %v5711_v11  ;;  %v1063_v14 = vcombine.low %v799_v24, %v803_v32  ;;  %v831_v42 = vrot.slane %v552_v36, %v5711_v11  ;;  %v570_v43 = vcombine.high %v566_v21, %v566_v21 }
  0x48   : > { %v1081_v40 = vcombine.low %v823_v28, %v827_v34  ;;  %v1088_v41 = vrot.slane %v1080_v35, %v5713_v12  ;;  %v835_v44 = vrot.slane %v566_v21, %v5711_v11  ;;  %v839_v46 = vrot.slane %v568_v22, %v5711_v11 }
  0x49   : > { %v1064_v19 = vcombine.low %v807_v33, %v811_v38  ;;  %v1071_v23 = vrot.slane %v1063_v14, %v5713_v12  ;;  %v586_v47 = vcombine.high %v578_v37, %v578_v37  ;;  %v594_v48 = vrot.slane %v578_v37, %v5705_v9 }
  0x4a   : > { %v1095_v45 = vrot.slane %v1081_v40, %v5713_v12  ;;  %v843_v50 = vrot.slane %v570_v43, %v5711_v11  ;;  %v1097_v51 = vcombine.low %v831_v42, %v835_v44  ;;  %v585_v52 = vrot.slane %v571_v39, %v5705_v9 }
  0x4b   : > { %v1078_v49 = vrot.slane %v1064_v19, %v5713_v12  ;;  %v608_v54 = vrot.slane %v586_v47, %v5705_v9  ;;  %v616_v55 = vcombine.high %v594_v48, %v594_v48  ;;  %v847_v56 = vrot.slane %v594_v48, %v5711_v11 }
  0x4c   : > { %v1096_v53 = vcombine.low %v1088_v41, %v1095_v45  ;;  %v1098_v58 = vcombine.low %v839_v46, %v843_v50  ;;  %v1105_v59 = vrot.slane %v1097_v51, %v5713_v12  ;;  %v587_v60 = vcombine.high %v585_v52, %v585_v52 }
  0x4d   : > { %v1079_v57 = vcombine.low %v1071_v23, %v1078_v49  ;;  %v618_v61 = vcombine.high %v608_v54, %v608_v54  ;;  %v851_v62 = vrot.slane %v608_v54, %v5711_v11  ;;  %v855_v63 = vrot.slane %v616_v55, %v5711_v11 }
  0x4e   : > { %1178 = vst.msk [vmem:[#allocation2 + $0xa1] sm:$0xff] %vm1165_vm1, %v1096_v53  ;;  %v601_v0 = vrot.slane %v585_v52, %v5705_v9  ;;  %v1112_v1 = vrot.slane %v1098_v58, %v5713_v12  ;;  %v615_v2 = vrot.slane %v587_v60, %v5705_v9  ;;  %v5637_v29 = vmov (!%p4642_p7), 0.0  }
  0x4f   : > { %1177 = vst.msk [vmem:[#allocation2 + $0x91] sm:$0xff] %vm1165_vm1, %v1079_v57  ;;  %v859_v3 = vrot.slane %v618_v61, %v5711_v11  ;;  %v1114_v4 = vcombine.low %v847_v56, %v851_v62  ;;  %1186 = vst.msk [vmem:[#allocation2 + $0x1] sm:$0xff] (!%p4642_p7), %vm1165_vm1, %v5637_v29 }
  0x50   : > { %v617_v5 = vcombine.high %v601_v0, %v601_v0  ;;  %v863_v6 = vrot.slane %v601_v0, %v5711_v11  ;;  %v1113_v7 = vcombine.low %v1105_v59, %v1112_v1  ;;  %v619_v8 = vcombine.high %v615_v2, %v615_v2  ;;  %1187 = vst.msk [vmem:[#allocation2 + $0x9] sm:$0xff] (!%p4642_p7), %vm1165_vm1, %v5637_v29 }
  0x51   : > { %v867_v10 = vrot.slane %v615_v2, %v5711_v11  ;;  %v1115_v13 = vcombine.low %v855_v63, %v859_v3  ;;  %v1122_v15 = vrot.slane %v1114_v4, %v5713_v12  ;;  %1188 = vst.msk [vmem:[#allocation2 + $0x11] sm:$0xff] (!%p4642_p7), %vm1165_vm1, %v5637_v29  ;;  %1189 = vst.msk [vmem:[#allocation2 + $0x19] sm:$0xff] (!%p4642_p7), %vm1165_vm1, %v5637_v29 }
  0x52   : > { %v871_v16 = vrot.slane %v617_v5, %v5711_v11  ;;  %1179 = vst.msk [vmem:[#allocation2 + $0xa9] sm:$0xff] %vm1165_vm1, %v1113_v7  ;;  %v875_v17 = vrot.slane %v619_v8, %v5711_v11 }
  0x53   : > { %v1131_v18 = vcombine.low %v863_v6, %v867_v10  ;;  %v1129_v20 = vrot.slane %v1115_v13, %v5713_v12 }
  0x54   : > { %v1132_v24 = vcombine.low %v871_v16, %v875_v17  ;;  %1185 = sbr.rel (%p4642_p7) target bundleno = 91 (0x5b), region = 36 }
  0x55   : > { %v1139_v25 = vrot.slane %v1131_v18, %v5713_v12  ;;  %v1130_v26 = vcombine.low %v1122_v15, %v1129_v20 }
  0x56   : > { %v1146_v27 = vrot.slane %v1132_v24, %v5713_v12 }
  0x57   : > { %1180 = vst.msk [vmem:[#allocation2 + $0xb1] sm:$0xff] %vm1165_vm1, %v1130_v26 }
  0x58   : > { %v1147_v28 = vcombine.low %v1139_v25, %v1146_v27 }
  0x5a   : > { %1181 = vst.msk [vmem:[#allocation2 + $0xb9] sm:$0xff] %vm1165_vm1, %v1147_v28 }
  0x5b PF: > { %p4643_p8 = scmp.le.s32.totalorder %s5616_s12, 0 }
  0x5c   : > { %s4644_s7 = sadd.s32 (!%p4643_p8), 4294967295, %s4640_s19 }
  0x5d   : > { %1193 = sbr.rel (%p4643_p8) target bundleno = 122 (0x7a), region = 40  ;;  %s4645_s8 = sshll.u32 (!%p4643_p8), %s4644_s7, 4 }
  0x5e   : > { %s1196_s9 = scalar_lea.vmem (!%p4643_p8), %s5703_s25, %s4645_s8 }
  0x5f   : > { %v1197_v30 = vld [vmem:[%s1196_s9] sm:$0xff] (!%p4643_p8)  ;;  %v1198_v32 = vld [vmem:[%s1196_s9 + $0x8] sm:$0xff] (!%p4643_p8) }
  0x60   : > { %v1208_v33 = vrot.slane (!%p4643_p8), %v1197_v30, %v5705_v9  ;;  %v1201_v31 = vcombine.high (!%p4643_p8), %v1197_v30, %v1197_v30  ;;  %v1257_v34 = vrot.slane (!%p4643_p8), %v1198_v32, %v5705_v9  ;;  %v1250_v35 = vcombine.high (!%p4643_p8), %v1198_v32, %v1198_v32 }
  0x62   : > { %v1216_v36 = vcombine.high (!%p4643_p8), %v1208_v33, %v1208_v33  ;;  %v1224_v37 = vrot.slane (!%p4643_p8), %v1208_v33, %v5705_v9  ;;  %v1215_v38 = vrot.slane (!%p4643_p8), %v1201_v31, %v5705_v9  ;;  %v1265_v14 = vcombine.high (!%p4643_p8), %v1257_v34, %v1257_v34 }
  0x63   : > { %v1273_v21 = vrot.slane (!%p4643_p8), %v1257_v34, %v5705_v9  ;;  %v1264_v39 = vrot.slane (!%p4643_p8), %v1250_v35, %v5705_v9 }
  0x64   : > { %v1238_v40 = vrot.slane %v1216_v36, %v5705_v9  ;;  %v1246_v41 = vcombine.high %v1224_v37, %v1224_v37  ;;  %v1302_v22 = vrot.slane %v1224_v37, %v5711_v11  ;;  %v1217_v42 = vcombine.high %v1215_v38, %v1215_v38 }
  0x65   : > { %v1231_v19 = vrot.slane %v1215_v38, %v5705_v9  ;;  %v1287_v23 = vrot.slane %v1265_v14, %v5705_v9  ;;  %v1295_v43 = vcombine.high %v1273_v21, %v1273_v21  ;;  %v1334_v44 = vrot.slane %v1273_v21, %v5711_v11 }
  0x66   : > { %v1248_v45 = vcombine.high %v1238_v40, %v1238_v40  ;;  %v1306_v46 = vrot.slane %v1238_v40, %v5711_v11  ;;  %v1310_v47 = vrot.slane %v1246_v41, %v5711_v11  ;;  %v1245_v48 = vrot.slane %v1217_v42, %v5705_v9 }
  0x67   : > { %v1247_v49 = vcombine.high %v1231_v19, %v1231_v19  ;;  %v1318_v50 = vrot.slane %v1231_v19, %v5711_v11  ;;  %v1297_v51 = vcombine.high %v1287_v23, %v1287_v23  ;;  %v1338_v52 = vrot.slane %v1287_v23, %v5711_v11 }
  0x68   : > { %v1314_v53 = vrot.slane %v1248_v45, %v5711_v11  ;;  %v1363_v54 = vcombine.low %v1302_v22, %v1306_v46  ;;  %v1249_v55 = vcombine.high %v1245_v48, %v1245_v48  ;;  %v1322_v56 = vrot.slane %v1245_v48, %v5711_v11 }
  0x69   : > { %v1326_v57 = vrot.slane %v1247_v49, %v5711_v11  ;;  %v1342_v58 = vrot.slane %v1295_v43, %v5711_v11  ;;  %v1346_v59 = vrot.slane %v1297_v51, %v5711_v11  ;;  %v1397_v60 = vcombine.low %v1334_v44, %v1338_v52 }
  0x6a   : > { %v1364_v61 = vcombine.low %v1310_v47, %v1314_v53  ;;  %v1371_v62 = vrot.slane %v1363_v54, %v5713_v12  ;;  %v1330_v63 = vrot.slane %v1249_v55, %v5711_v11  ;;  %v1380_v0 = vcombine.low %v1318_v50, %v1322_v56 }
  0x6b   : > { %v1398_v1 = vcombine.low %v1342_v58, %v1346_v59  ;;  %v1405_v2 = vrot.slane %v1397_v60, %v5713_v12  ;;  %v1266_v3 = vcombine.high %v1264_v39, %v1264_v39  ;;  %v1280_v4 = vrot.slane %v1264_v39, %v5705_v9 }
  0x6c   : > { %v1378_v5 = vrot.slane %v1364_v61, %v5713_v12  ;;  %v1381_v6 = vcombine.low %v1326_v57, %v1330_v63  ;;  %v1388_v7 = vrot.slane %v1380_v0, %v5713_v12 }
  0x6d   : > { %v1412_v8 = vrot.slane %v1398_v1, %v5713_v12  ;;  %v1294_v10 = vrot.slane %v1266_v3, %v5705_v9  ;;  %v1296_v13 = vcombine.high %v1280_v4, %v1280_v4  ;;  %v1350_v15 = vrot.slane %v1280_v4, %v5711_v11 }
  0x6e   : > { %v1379_v16 = vcombine.low %v1371_v62, %v1378_v5  ;;  %v1395_v17 = vrot.slane %v1381_v6, %v5713_v12 }
  0x6f   : > { %v1413_v18 = vcombine.low %v1405_v2, %v1412_v8  ;;  %v1298_v20 = vcombine.high %v1294_v10, %v1294_v10  ;;  %v1354_v24 = vrot.slane %v1294_v10, %v5711_v11  ;;  %v1358_v25 = vrot.slane %v1296_v13, %v5711_v11 }
  0x70   : > { %1435 = vst.msk [vmem:[#allocation2 + $0x1] sm:$0xff] %vm1165_vm1, %v1379_v16  ;;  %v1396_v26 = vcombine.low %v1388_v7, %v1395_v17 }
  0x71   : > { %1437 = vst.msk [vmem:[#allocation2 + $0x11] sm:$0xff] %vm1165_vm1, %v1413_v18  ;;  %v1362_v27 = vrot.slane %v1298_v20, %v5711_v11  ;;  %v1414_v28 = vcombine.low %v1350_v15, %v1354_v24 }
  0x72   : > { %1436 = vst.msk [vmem:[#allocation2 + $0x9] sm:$0xff] %vm1165_vm1, %v1396_v26 }
  0x73   : > { %v1415_v29 = vcombine.low %v1358_v25, %v1362_v27  ;;  %v1422_v30 = vrot.slane %v1414_v28, %v5713_v12 }
  0x75   : > { %v1429_v32 = vrot.slane %v1415_v29, %v5713_v12 }
  0x77   : > { %v1430_v33 = vcombine.low %v1422_v30, %v1429_v32 }
  0x79   : > { %1438 = vst.msk [vmem:[#allocation2 + $0x19] sm:$0xff] %vm1165_vm1, %v1430_v33 }
  0x7a PF: > { %p4646_p9 = scmp.ne.s32.totalorder %s5616_s12, 3 }
  0x7b   : > { %v5638_v31 = vmov (!%p4646_p9), 0.0  }
  0x7c   : > { %1442 = sbr.rel (%p4646_p9) target bundleno = 131 (0x83), region = 44  ;;  %1444 = vst.msk [vmem:[#allocation2 + $0xc9] sm:$0xff] (!%p4646_p9), %vm1165_vm1, %v5638_v31  ;;  %1445 = vst.msk [vmem:[#allocation2 + $0xd1] sm:$0xff] (!%p4646_p9), %vm1165_vm1, %v5638_v31 }
  0x7d   : > { %1446 = vst.msk [vmem:[#allocation2 + $0xd9] sm:$0xff] (!%p4646_p9), %vm1165_vm1, %v5638_v31  ;;  %1447 = vst.msk [vmem:[#allocation2 + $0xe1] sm:$0xff] (!%p4646_p9), %vm1165_vm1, %v5638_v31 }
  0x83 PF: > { %p4647_p10 = scmp.ge.s32.totalorder %s5616_s12, 3 }
  0x84   : > { %v4650_v34 = vld [vmem:[%s5708_s27 + $0x40] sm:$0xff] (!%p4647_p10)  ;;  %v4651_v35 = vld [vmem:[%s5708_s27 + $0x48] sm:$0xff] (!%p4647_p10) }
  0x85   : > { %1451 = sbr.rel (%p4647_p10) target bundleno = 159 (0x9f), region = 48  ;;  %v1466_v36 = vrot.slane (!%p4647_p10), %v4650_v34, %v5705_v9  ;;  %v1459_v37 = vcombine.high (!%p4647_p10), %v4650_v34, %v4650_v34  ;;  %v1515_v38 = vrot.slane (!%p4647_p10), %v4651_v35, %v5705_v9  ;;  %v1508_v14 = vcombine.high (!%p4647_p10), %v4651_v35, %v4651_v35 }
  0x87   : > { %v1474_v21 = vcombine.high (!%p4647_p10), %v1466_v36, %v1466_v36  ;;  %v1482_v39 = vrot.slane (!%p4647_p10), %v1466_v36, %v5705_v9  ;;  %v1473_v40 = vrot.slane (!%p4647_p10), %v1459_v37, %v5705_v9  ;;  %v1523_v41 = vcombine.high (!%p4647_p10), %v1515_v38, %v1515_v38 }
  0x88   : > { %v1531_v22 = vrot.slane (!%p4647_p10), %v1515_v38, %v5705_v9  ;;  %v1522_v42 = vrot.slane (!%p4647_p10), %v1508_v14, %v5705_v9 }
  0x89   : > { %v1496_v19 = vrot.slane (!%p4647_p10), %v1474_v21, %v5705_v9  ;;  %v1504_v23 = vcombine.high (!%p4647_p10), %v1482_v39, %v1482_v39  ;;  %v1560_v43 = vrot.slane (!%p4647_p10), %v1482_v39, %v5711_v11  ;;  %v1475_v44 = vcombine.high (!%p4647_p10), %v1473_v40, %v1473_v40 }
  0x8a   : > { %v1489_v45 = vrot.slane (!%p4647_p10), %v1473_v40, %v5705_v9  ;;  %v1545_v46 = vrot.slane (!%p4647_p10), %v1523_v41, %v5705_v9  ;;  %v1553_v47 = vcombine.high (!%p4647_p10), %v1531_v22, %v1531_v22  ;;  %v1592_v48 = vrot.slane (!%p4647_p10), %v1531_v22, %v5711_v11 }
  0x8b   : > { %v1506_v49 = vcombine.high (!%p4647_p10), %v1496_v19, %v1496_v19  ;;  %v1564_v50 = vrot.slane (!%p4647_p10), %v1496_v19, %v5711_v11  ;;  %v1568_v51 = vrot.slane (!%p4647_p10), %v1504_v23, %v5711_v11  ;;  %v1503_v52 = vrot.slane (!%p4647_p10), %v1475_v44, %v5705_v9 }
  0x8c   : > { %v1505_v53 = vcombine.high %v1489_v45, %v1489_v45  ;;  %v1576_v54 = vrot.slane %v1489_v45, %v5711_v11  ;;  %v1555_v55 = vcombine.high %v1545_v46, %v1545_v46  ;;  %v1596_v56 = vrot.slane %v1545_v46, %v5711_v11 }
  0x8d   : > { %v1572_v57 = vrot.slane %v1506_v49, %v5711_v11  ;;  %v1621_v58 = vcombine.low %v1560_v43, %v1564_v50  ;;  %v1507_v59 = vcombine.high %v1503_v52, %v1503_v52  ;;  %v1580_v60 = vrot.slane %v1503_v52, %v5711_v11 }
  0x8e   : > { %v1584_v61 = vrot.slane %v1505_v53, %v5711_v11  ;;  %v1600_v62 = vrot.slane %v1553_v47, %v5711_v11  ;;  %v1604_v63 = vrot.slane %v1555_v55, %v5711_v11  ;;  %v1655_v0 = vcombine.low %v1592_v48, %v1596_v56 }
  0x8f   : > { %v1622_v1 = vcombine.low %v1568_v51, %v1572_v57  ;;  %v1629_v2 = vrot.slane %v1621_v58, %v5713_v12  ;;  %v1588_v3 = vrot.slane %v1507_v59, %v5711_v11  ;;  %v1638_v4 = vcombine.low %v1576_v54, %v1580_v60 }
  0x90   : > { %v1656_v5 = vcombine.low %v1600_v62, %v1604_v63  ;;  %v1663_v6 = vrot.slane %v1655_v0, %v5713_v12  ;;  %v1524_v7 = vcombine.high %v1522_v42, %v1522_v42  ;;  %v1538_v8 = vrot.slane %v1522_v42, %v5705_v9 }
  0x91   : > { %v1636_v10 = vrot.slane %v1622_v1, %v5713_v12  ;;  %v1639_v13 = vcombine.low %v1584_v61, %v1588_v3  ;;  %v1646_v15 = vrot.slane %v1638_v4, %v5713_v12 }
  0x92   : > { %v1670_v16 = vrot.slane %v1656_v5, %v5713_v12  ;;  %v1552_v17 = vrot.slane %v1524_v7, %v5705_v9  ;;  %v1554_v18 = vcombine.high %v1538_v8, %v1538_v8  ;;  %v1608_v20 = vrot.slane %v1538_v8, %v5711_v11 }
  0x93   : > { %v1637_v24 = vcombine.low %v1629_v2, %v1636_v10  ;;  %v1653_v25 = vrot.slane %v1639_v13, %v5713_v12 }
  0x94   : > { %v1671_v26 = vcombine.low %v1663_v6, %v1670_v16  ;;  %v1556_v27 = vcombine.high %v1552_v17, %v1552_v17  ;;  %v1612_v28 = vrot.slane %v1552_v17, %v5711_v11  ;;  %v1616_v29 = vrot.slane %v1554_v18, %v5711_v11 }
  0x95   : > { %1694 = vst.msk [vmem:[#allocation2 + $0xc9] sm:$0xff] %vm1165_vm1, %v1637_v24  ;;  %v1654_v30 = vcombine.low %v1646_v15, %v1653_v25 }
  0x96   : > { %1696 = vst.msk [vmem:[#allocation2 + $0xd9] sm:$0xff] %vm1165_vm1, %v1671_v26  ;;  %v1620_v32 = vrot.slane %v1556_v27, %v5711_v11  ;;  %v1672_v9 = vcombine.low %v1608_v20, %v1612_v28 }
  0x97   : > { %1695 = vst.msk [vmem:[#allocation2 + $0xd1] sm:$0xff] %vm1165_vm1, %v1654_v30 }
  0x98   : > { %v1673_v33 = vcombine.low %v1616_v29, %v1620_v32  ;;  %v1680_v31 = vrot.slane %v1672_v9, %v5713_v12 }
  0x9a   : > { %v1687_v34 = vrot.slane %v1673_v33, %v5713_v12 }
  0x9c   : > { %v1688_v35 = vcombine.low %v1680_v31, %v1687_v34 }
  0x9e   : > { %1697 = vst.msk [vmem:[#allocation2 + $0xe1] sm:$0xff] %vm1165_vm1, %v1688_v35 }
  0x9f PF: > { %v4652_v36 = vld [vmem:[%s6670_s1 + $0x4] sm:$0xf]  ;;  %vm1782_vm2 = vcmask 1043456   ;;  %v4761_v11 = vld [vmem:[%s6670_s1 + $0x1c] sm:$0xf]  ;;  %v6013_v38 = vld [vmem:[#allocation2 + $0x29] sm:$0xff] }
  0xa0   : > { %v1716_v37 = vld [vmem:[#allocation2 + $0x1] sm:$0xff]  ;;  %5077 = vmatprep.subr.msk.mxu0 %vm1782_vm2, %v4652_v36  ;;  %5233 = vmatprep.subr.msk.mxu1 %vm1782_vm2, %v4761_v11  ;;  %v1717_v12 = vld [vmem:[#allocation2 + $0x9] sm:$0xff]  ;;  %v6020_v21 = vld [vmem:[#allocation2 + $0x31] sm:$0xff] }
  0xa1   : > { %v1715_v14 = vld [vmem:[%s6670_s1] sm:$0xf]  ;;  %5078 = vmatpush3.msk.msra.mxu0 %vm1782_vm2, %v4652_v36  ;;  %5079 = vmatprep.mubr.msk.f32.mxu0 %vm1165_vm1, %v1716_v37  ;;  %v4760_v39 = vld [vmem:[%s6670_s1 + $0x18] sm:$0xf]  ;;  %v4687_v23 = vld [vmem:[%s6670_s1 + $0x8] sm:$0xf] }
  0xa2   : > { %5234 = vmatpush3.msk.msra.mxu1 %vm1782_vm2, %v4761_v11  ;;  %5235 = vmatprep.mubr.msk.f32.mxu1 %vm1165_vm1, %v6013_v38  ;;  %v1718_v40 = vld [vmem:[#allocation2 + $0x11] sm:$0xff]  ;;  %v6030_v41 = vld [vmem:[#allocation2 + $0x39] sm:$0xff]  ;;  %v6037_v42 = vld [vmem:[#allocation2 + $0x41] sm:$0xff] }
  0xa3   : > { %5080 = vmatmul.mubr.msk.f32.vlgmr.msra.gmra.mrb[0].mxu0 %vm1165_vm1, %v1717_v12  ;;  %5103 = vmatprep.subr.msk.mxu0 %vm1782_vm2, %v1715_v14  ;;  %v1719_v22 = vld [vmem:[#allocation2 + $0x19] sm:$0xff]  ;;  %v6042_v19 = vld [vmem:[#allocation2 + $0x51] sm:$0xff]  ;;  %v6060_v45 = vld [vmem:[#allocation2 + $0x61] sm:$0xff] }
  0xa4   : > { %5236 = vmatmul.mubr.msk.f32.vlgmr.msra.gmra.mrb[0].mxu1 %vm1165_vm1, %v6020_v21  ;;  %5259 = vmatprep.subr.msk.mxu1 %vm1782_vm2, %v4760_v39  ;;  %v4796_v43 = vld [vmem:[%s6670_s1 + $0x20] sm:$0xf]  ;;  %v6071_v46 = vld [vmem:[#allocation2 + $0x69] sm:$0xff]  ;;  %v6095_v50 = vld [vmem:[#allocation2 + $0x91] sm:$0xff] }
  0xa5   : > { %5104 = vmatpush3.msk.msra.mxu0 %vm1782_vm2, %v1715_v14  ;;  %5260 = vmatpush3.msk.msra.mxu1 %vm1782_vm2, %v4760_v39  ;;  %v6057_v44 = vld [vmem:[#allocation2 + $0x59] sm:$0xff]  ;;  %v6083_v48 = vld [vmem:[#allocation2 + $0x81] sm:$0xff]  ;;  %v6085_v49 = vld [vmem:[#allocation2 + $0x89] sm:$0xff] }
  0xa6   : > { %5082 = vmatprep.mubr.msk.f32.mxu0 %vm1165_vm1, %v1718_v40  ;;  %5238 = vmatprep.mubr.msk.f32.mxu1 %vm1165_vm1, %v6030_v41  ;;  %v6073_v47 = vld [vmem:[#allocation2 + $0x79] sm:$0xff]  ;;  %v6097_v51 = vld [vmem:[#allocation2 + $0xa1] sm:$0xff]  ;;  %v6107_v52 = vld [vmem:[#allocation2 + $0xa9] sm:$0xff] }
  0xa7   : > { %5083 = vmatmul.mubr.msk.f32.gmra.mrb[2].mxu0 %vm1165_vm1, %v1719_v22  ;;  %5129 = vmatprep.subr.msk.mxu0 %vm1782_vm2, %v4687_v23  ;;  %v6109_v53 = vld [vmem:[#allocation2 + $0xb1] sm:$0xff]  ;;  %v6119_v54 = vld [vmem:[#allocation2 + $0xb9] sm:$0xff]  ;;  %v6121_v56 = vld [vmem:[#allocation2 + $0x28] sm:$0xff] }
  0xa8   : > { %5239 = vmatmul.mubr.msk.f32.gmra.mrb[2].mxu1 %vm1165_vm1, %v6037_v42  ;;  %5085 = vmatprep.mubr.msk.f32.mxu0 %vm1165_vm1, %v6013_v38  ;;  %v1699_v55 = vld [vmem:[#allocation2] sm:$0xff]  ;;  %v1700_v57 = vld [vmem:[#allocation2 + $0x8] sm:$0xff]  ;;  %v6130_v58 = vld [vmem:[#allocation2 + $0x30] sm:$0xff] }
  0xa9   : > { %5241 = vmatprep.mubr.msk.f32.mxu1 %vm1165_vm1, %v6042_v19  ;;  %5285 = vmatprep.subr.msk.mxu1 %vm1782_vm2, %v4796_v43  ;;  %v1701_v59 = vld [vmem:[#allocation2 + $0x10] sm:$0xff]  ;;  %v6133_v60 = vld [vmem:[#allocation2 + $0x38] sm:$0xff]  ;;  %v4705_v61 = vld [vmem:[%s6670_s1 + $0xc] sm:$0xf] }
  0xaa   : > { %v1702_v62 = vld [vmem:[#allocation2 + $0x18] sm:$0xff]  ;;  %v4814_v63 = vld [vmem:[%s6670_s1 + $0x24] sm:$0xf]  ;;  %v6150_v1 = vld [vmem:[#allocation2 + $0x50] sm:$0xff] }
  0xab   : > { %5086 = vmatmul.mubr.msk.f32.gmra.mrb[4].mxu0 %vm1165_vm1, %v6020_v21  ;;  %v6146_v0 = vld [vmem:[#allocation2 + $0x40] sm:$0xff]  ;;  %v6161_v2 = vld [vmem:[#allocation2 + $0x58] sm:$0xff]  ;;  %v6173_v4 = vld [vmem:[#allocation2 + $0x68] sm:$0xff] }
  0xac   : > { %5242 = vmatmul.mubr.msk.f32.gmra.mrb[4].mxu1 %vm1165_vm1, %v6057_v44  ;;  %5088 = vmatprep.mubr.msk.f32.mxu0 %vm1165_vm1, %v6030_v41  ;;  %v6163_v3 = vld [vmem:[#allocation2 + $0x60] sm:$0xff]  ;;  %v6175_v5 = vld [vmem:[#allocation2 + $0x78] sm:$0xff]  ;;  %v6187_v7 = vld [vmem:[#allocation2 + $0x88] sm:$0xff] }
  0xad   : > { %5244 = vmatprep.mubr.msk.f32.mxu1 %vm1165_vm1, %v6060_v45  ;;  %v6185_v6 = vld [vmem:[#allocation2 + $0x80] sm:$0xff]  ;;  %v6197_v8 = vld [vmem:[#allocation2 + $0x90] sm:$0xff]  ;;  %v6209_v13 = vld [vmem:[#allocation2 + $0xa8] sm:$0xff] }
  0xae   : > { %v6199_v10 = vld [vmem:[#allocation2 + $0xa0] sm:$0xff]  ;;  %v6211_v15 = vld [vmem:[#allocation2 + $0xb0] sm:$0xff]  ;;  %v6221_v16 = vld [vmem:[#allocation2 + $0xb8] sm:$0xff] }
  0xaf   : > { %5089 = vmatmul.mubr.msk.f32.gmra.mrb[6].mxu0 %vm1165_vm1, %v6037_v42  ;;  %v2127_v17 = vld [vmem:[#allocation2 + $0x2] sm:$0xff]  ;;  %v6223_v18 = vld [vmem:[#allocation2 + $0x2a] sm:$0xff]  ;;  %v6232_v24 = vld [vmem:[#allocation2 + $0x32] sm:$0xff] }
  0xb0   : > { %5245 = vmatmul.mubr.msk.f32.gmra.mrb[6].mxu1 %vm1165_vm1, %v6071_v46  ;;  %5091 = vmatprep.mubr.msk.f32.mxu0 %vm1165_vm1, %v6042_v19  ;;  %v2128_v20 = vld [vmem:[#allocation2 + $0xa] sm:$0xff]  ;;  %v2129_v25 = vld [vmem:[#allocation2 + $0x12] sm:$0xff]  ;;  %v6235_v26 = vld [vmem:[#allocation2 + $0x3a] sm:$0xff] }
  0xb1   : > { %5247 = vmatprep.mubr.msk.f32.mxu1 %vm1165_vm1, %v6073_v47  ;;  %v4723_v27 = vld [vmem:[%s6670_s1 + $0x10] sm:$0xf]  ;;  %v2130_v28 = vld [vmem:[#allocation2 + $0x1a] sm:$0xff]  ;;  %v4832_v29 = vld [vmem:[%s6670_s1 + $0x28] sm:$0xf] }
  0xb2   : > { %v6248_v30 = vld [vmem:[#allocation2 + $0x42] sm:$0xff]  ;;  %v6252_v32 = vld [vmem:[#allocation2 + $0x52] sm:$0xff]  ;;  %v6263_v9 = vld [vmem:[#allocation2 + $0x5a] sm:$0xff] }
  0xb3   : > { %5092 = vmatmul.mubr.msk.f32.gmra.mrb[8].mxu0 %vm1165_vm1, %v6057_v44  ;;  %v6265_v33 = vld [vmem:[#allocation2 + $0x62] sm:$0xff]  ;;  %v6275_v31 = vld [vmem:[#allocation2 + $0x6a] sm:$0xff]  ;;  %v6277_v34 = vld [vmem:[#allocation2 + $0x7a] sm:$0xff] }
  0xb4   : > { %5248 = vmatmul.mubr.msk.f32.gmra.mrb[8].mxu1 %vm1165_vm1, %v6083_v48  ;;  %5094 = vmatprep.mubr.msk.f32.mxu0 %vm1165_vm1, %v6060_v45  ;;  %v6287_v35 = vld [vmem:[#allocation2 + $0x82] sm:$0xff]  ;;  %v6289_v36 = vld [vmem:[#allocation2 + $0x8a] sm:$0xff]  ;;  %v6299_v11 = vld [vmem:[#allocation2 + $0x92] sm:$0xff] }
  0xb5   : > { %5250 = vmatprep.mubr.msk.f32.mxu1 %vm1165_vm1, %v6085_v49  ;;  %v6301_v37 = vld [vmem:[#allocation2 + $0xa2] sm:$0xff]  ;;  %v6311_v12 = vld [vmem:[#allocation2 + $0xaa] sm:$0xff]  ;;  %v6313_v14 = vld [vmem:[#allocation2 + $0xb2] sm:$0xff] }
  0xb6   : > { %v6323_v39 = vld [vmem:[#allocation2 + $0xba] sm:$0xff]  ;;  %v4741_v40 = vld [vmem:[%s6670_s1 + $0x14] sm:$0xf]  ;;  %v4850_v22 = vld [vmem:[%s6670_s1 + $0x2c] sm:$0xf] }
  0xb7   : > { %5095 = vmatmul.mubr.msk.f32.gmra.mrb[10].mxu0 %vm1165_vm1, %v6071_v46 }
  0xb8   : > { %5251 = vmatmul.mubr.msk.f32.gmra.mrb[10].mxu1 %vm1165_vm1, %v6095_v50  ;;  %5097 = vmatprep.mubr.msk.f32.mxu0 %vm1165_vm1, %v6073_v47 }
  0xb9   : > { %5253 = vmatprep.mubr.msk.f32.mxu1 %vm1165_vm1, %v6097_v51 }
  0xbb   : > { %5098 = vmatmul.mubr.msk.f32.gmra.mrb[12].mxu0 %vm1165_vm1, %v6083_v48 }
  0xbc   : > { %5254 = vmatmul.mubr.msk.f32.gmra.mrb[12].mxu1 %vm1165_vm1, %v6107_v52  ;;  %5100 = vmatprep.mubr.msk.f32.mxu0 %vm1165_vm1, %v6085_v49 }
  0xbd   : > { %5256 = vmatprep.mubr.msk.f32.mxu1 %vm1165_vm1, %v6109_v53 }
  0xbf   : > { %5101 = vmatmul.mubr.msk.f32.gmra.mrb[14].mxu0 %vm1165_vm1, %v6095_v50 }
  0xc0   : > { %5257 = vmatmul.mubr.msk.f32.gmra.mrb[14].mxu1 %vm1165_vm1, %v6119_v54  ;;  %5105 = vmatprep.mubr.msk.f32.mxu0 %vm1165_vm1, %v1699_v55  ;;  %v3758_v55 = vld [vmem:[#allocation2 + $0xd8] sm:$0xff] }
  0xc1   : > { %5261 = vmatprep.mubr.msk.f32.mxu1 %vm1165_vm1, %v6121_v56 }
  0xc3   : > { %5106 = vmatmul.mubr.msk.f32.vlgmr.msra.gmra.mrb[0].mxu0 %vm1165_vm1, %v1700_v57 }
  0xc4   : > { %5262 = vmatmul.mubr.msk.f32.vlgmr.msra.gmra.mrb[0].mxu1 %vm1165_vm1, %v6130_v58  ;;  %5130 = vmatpush3.msk.msra.mxu0 %vm1782_vm2, %v4687_v23  ;;  %v3756_v23 = vld [vmem:[#allocation2 + $0xc8] sm:$0xff] }
  0xc5   : > { %5286 = vmatpush3.msk.msra.mxu1 %vm1782_vm2, %v4796_v43  ;;  %5108 = vmatprep.mubr.msk.f32.mxu0 %vm1165_vm1, %v1701_v59  ;;  %v3757_v43 = vld [vmem:[#allocation2 + $0xd0] sm:$0xff] }
  0xc6   : > { %5264 = vmatprep.mubr.msk.f32.mxu1 %vm1165_vm1, %v6133_v60  ;;  %5155 = vmatprep.subr.msk.mxu0 %vm1782_vm2, %v4705_v61 }
  0xc7   : > { %5109 = vmatmul.mubr.msk.f32.gmra.mrb[2].mxu0 %vm1165_vm1, %v1702_v62  ;;  %5311 = vmatprep.subr.msk.mxu1 %vm1782_vm2, %v4814_v63 }
  0xc8   : > { %5265 = vmatmul.mubr.msk.f32.gmra.mrb[2].mxu1 %vm1165_vm1, %v6146_v0  ;;  %5111 = vmatprep.mubr.msk.f32.mxu0 %vm1165_vm1, %v6121_v56 }
  0xc9   : > { %5267 = vmatprep.mubr.msk.f32.mxu1 %vm1165_vm1, %v6150_v1 }
  0xcb   : > { %5112 = vmatmul.mubr.msk.f32.gmra.mrb[4].mxu0 %vm1165_vm1, %v6130_v58 }
  0xcc   : > { %5268 = vmatmul.mubr.msk.f32.gmra.mrb[4].mxu1 %vm1165_vm1, %v6161_v2  ;;  %5114 = vmatprep.mubr.msk.f32.mxu0 %vm1165_vm1, %v6133_v60 }
  0xcd   : > { %5270 = vmatprep.mubr.msk.f32.mxu1 %vm1165_vm1, %v6163_v3 }
  0xcf   : > { %5115 = vmatmul.mubr.msk.f32.gmra.mrb[6].mxu0 %vm1165_vm1, %v6146_v0 }
  0xd0   : > { %5271 = vmatmul.mubr.msk.f32.gmra.mrb[6].mxu1 %vm1165_vm1, %v6173_v4  ;;  %5117 = vmatprep.mubr.msk.f32.mxu0 %vm1165_vm1, %v6150_v1 }
  0xd1   : > { %5273 = vmatprep.mubr.msk.f32.mxu1 %vm1165_vm1, %v6175_v5 }
  0xd3   : > { %5118 = vmatmul.mubr.msk.f32.gmra.mrb[8].mxu0 %vm1165_vm1, %v6161_v2 }
  0xd4   : > { %5274 = vmatmul.mubr.msk.f32.gmra.mrb[8].mxu1 %vm1165_vm1, %v6185_v6  ;;  %5120 = vmatprep.mubr.msk.f32.mxu0 %vm1165_vm1, %v6163_v3 }
  0xd5   : > { %5276 = vmatprep.mubr.msk.f32.mxu1 %vm1165_vm1, %v6187_v7 }
  0xd7   : > { %5121 = vmatmul.mubr.msk.f32.gmra.mrb[10].mxu0 %vm1165_vm1, %v6173_v4 }
  0xd8   : > { %5277 = vmatmul.mubr.msk.f32.gmra.mrb[10].mxu1 %vm1165_vm1, %v6197_v8  ;;  %5123 = vmatprep.mubr.msk.f32.mxu0 %vm1165_vm1, %v6175_v5 }
  0xd9   : > { %5279 = vmatprep.mubr.msk.f32.mxu1 %vm1165_vm1, %v6199_v10 }
  0xdb   : > { %5124 = vmatmul.mubr.msk.f32.gmra.mrb[12].mxu0 %vm1165_vm1, %v6185_v6 }
  0xdc   : > { %5280 = vmatmul.mubr.msk.f32.gmra.mrb[12].mxu1 %vm1165_vm1, %v6209_v13  ;;  %5126 = vmatprep.mubr.msk.f32.mxu0 %vm1165_vm1, %v6187_v7 }
  0xdd   : > { %5282 = vmatprep.mubr.msk.f32.mxu1 %vm1165_vm1, %v6211_v15 }
  0xdf   : > { %5127 = vmatmul.mubr.msk.f32.gmra.mrb[14].mxu0 %vm1165_vm1, %v6197_v8 }
  0xe0   : > { %5283 = vmatmul.mubr.msk.f32.gmra.mrb[14].mxu1 %vm1165_vm1, %v6221_v16  ;;  %5131 = vmatprep.mubr.msk.f32.mxu0 %vm1165_vm1, %v2127_v17 }
  0xe1   : > { %5287 = vmatprep.mubr.msk.f32.mxu1 %vm1165_vm1, %v6223_v18 }
  0xe3   : > { %5132 = vmatmul.mubr.msk.f32.vlgmr.msra.gmra.mrb[0].mxu0 %vm1165_vm1, %v2128_v20 }
  0xe4   : > { %5288 = vmatmul.mubr.msk.f32.vlgmr.msra.gmra.mrb[0].mxu1 %vm1165_vm1, %v6232_v24  ;;  %5156 = vmatpush3.msk.msra.mxu0 %vm1782_vm2, %v4705_v61 }
  0xe5   : > { %5312 = vmatpush3.msk.msra.mxu1 %vm1782_vm2, %v4814_v63  ;;  %5134 = vmatprep.mubr.msk.f32.mxu0 %vm1165_vm1, %v2129_v25 }
  0xe6   : > { %5290 = vmatprep.mubr.msk.f32.mxu1 %vm1165_vm1, %v6235_v26  ;;  %5181 = vmatprep.subr.msk.mxu0 %vm1782_vm2, %v4723_v27 }
  0xe7   : > { %5135 = vmatmul.mubr.msk.f32.gmra.mrb[2].mxu0 %vm1165_vm1, %v2130_v28  ;;  %5337 = vmatprep.subr.msk.mxu1 %vm1782_vm2, %v4832_v29 }
  0xe8   : > { %5291 = vmatmul.mubr.msk.f32.gmra.mrb[2].mxu1 %vm1165_vm1, %v6248_v30  ;;  %5137 = vmatprep.mubr.msk.f32.mxu0 %vm1165_vm1, %v6223_v18 }
  0xe9   : > { %5293 = vmatprep.mubr.msk.f32.mxu1 %vm1165_vm1, %v6252_v32 }
  0xeb   : > { %5138 = vmatmul.mubr.msk.f32.gmra.mrb[4].mxu0 %vm1165_vm1, %v6232_v24 }
  0xec   : > { %5294 = vmatmul.mubr.msk.f32.gmra.mrb[4].mxu1 %vm1165_vm1, %v6263_v9  ;;  %5140 = vmatprep.mubr.msk.f32.mxu0 %vm1165_vm1, %v6235_v26 }
  0xed   : > { %5296 = vmatprep.mubr.msk.f32.mxu1 %vm1165_vm1, %v6265_v33 }
  0xef   : > { %5141 = vmatmul.mubr.msk.f32.gmra.mrb[6].mxu0 %vm1165_vm1, %v6248_v30 }
  0xf0   : > { %5297 = vmatmul.mubr.msk.f32.gmra.mrb[6].mxu1 %vm1165_vm1, %v6275_v31  ;;  %5143 = vmatprep.mubr.msk.f32.mxu0 %vm1165_vm1, %v6252_v32 }
  0xf1   : > { %5299 = vmatprep.mubr.msk.f32.mxu1 %vm1165_vm1, %v6277_v34 }
  0xf3   : > { %5144 = vmatmul.mubr.msk.f32.gmra.mrb[8].mxu0 %vm1165_vm1, %v6263_v9 }
  0xf4   : > { %5300 = vmatmul.mubr.msk.f32.gmra.mrb[8].mxu1 %vm1165_vm1, %v6287_v35  ;;  %5146 = vmatprep.mubr.msk.f32.mxu0 %vm1165_vm1, %v6265_v33 }
  0xf5   : > { %5302 = vmatprep.mubr.msk.f32.mxu1 %vm1165_vm1, %v6289_v36 }
  0xf7   : > { %5147 = vmatmul.mubr.msk.f32.gmra.mrb[10].mxu0 %vm1165_vm1, %v6275_v31 }
  0xf8   : > { %5303 = vmatmul.mubr.msk.f32.gmra.mrb[10].mxu1 %vm1165_vm1, %v6299_v11  ;;  %5149 = vmatprep.mubr.msk.f32.mxu0 %vm1165_vm1, %v6277_v34 }
  0xf9   : > { %5305 = vmatprep.mubr.msk.f32.mxu1 %vm1165_vm1, %v6301_v37 }
  0xfb   : > { %5150 = vmatmul.mubr.msk.f32.gmra.mrb[12].mxu0 %vm1165_vm1, %v6287_v35 }
  0xfc   : > { %5306 = vmatmul.mubr.msk.f32.gmra.mrb[12].mxu1 %vm1165_vm1, %v6311_v12  ;;  %5152 = vmatprep.mubr.msk.f32.mxu0 %vm1165_vm1, %v6289_v36 }
  0xfd   : > { %5308 = vmatprep.mubr.msk.f32.mxu1 %vm1165_vm1, %v6313_v14 }
  0xff   : > { %5153 = vmatmul.mubr.msk.f32.gmra.mrb[14].mxu0 %vm1165_vm1, %v6299_v11 }
 0x100   : > { %5309 = vmatmul.mubr.msk.f32.gmra.mrb[14].mxu1 %vm1165_vm1, %v6323_v39  ;;  %5157 = vmatprep.mubr.msk.f32.mxu0 %vm1165_vm1, %v6121_v56  ;;  %v3759_v56 = vld [vmem:[#allocation2 + $0xe0] sm:$0xff] }
 0x101   : > { %5313 = vmatprep.mubr.msk.f32.mxu1 %vm1165_vm1, %v6150_v1 }
 0x103   : > { %5158 = vmatmul.mubr.msk.f32.vlgmr.msra.gmra.mrb[0].mxu0 %vm1165_vm1, %v6130_v58 }
 0x104   : > { %5314 = vmatmul.mubr.msk.f32.vlgmr.msra.gmra.mrb[0].mxu1 %vm1165_vm1, %v6161_v2  ;;  %5182 = vmatpush3.msk.msra.mxu0 %vm1782_vm2, %v4723_v27 }
 0x105   : > { %5338 = vmatpush3.msk.msra.mxu1 %vm1782_vm2, %v4832_v29  ;;  %5160 = vmatprep.mubr.msk.f32.mxu0 %vm1165_vm1, %v6133_v60 }
 0x106   : > { %5316 = vmatprep.mubr.msk.f32.mxu1 %vm1165_vm1, %v6163_v3  ;;  %5207 = vmatprep.subr.msk.mxu0 %vm1782_vm2, %v4741_v40 }
 0x107   : > { %5161 = vmatmul.mubr.msk.f32.gmra.mrb[2].mxu0 %vm1165_vm1, %v6146_v0  ;;  %5363 = vmatprep.subr.msk.mxu1 %vm1782_vm2, %v4850_v22 }
 0x108   : > { %5317 = vmatmul.mubr.msk.f32.gmra.mrb[2].mxu1 %vm1165_vm1, %v6173_v4  ;;  %5163 = vmatprep.mubr.msk.f32.mxu0 %vm1165_vm1, %v6150_v1 }
 0x109   : > { %5319 = vmatprep.mubr.msk.f32.mxu1 %vm1165_vm1, %v6175_v5 }
 0x10b   : > { %5164 = vmatmul.mubr.msk.f32.gmra.mrb[4].mxu0 %vm1165_vm1, %v6161_v2 }
 0x10c   : > { %5320 = vmatmul.mubr.msk.f32.gmra.mrb[4].mxu1 %vm1165_vm1, %v6185_v6  ;;  %5166 = vmatprep.mubr.msk.f32.mxu0 %vm1165_vm1, %v6163_v3 }
 0x10d   : > { %5322 = vmatprep.mubr.msk.f32.mxu1 %vm1165_vm1, %v6187_v7 }
 0x10f   : > { %5167 = vmatmul.mubr.msk.f32.gmra.mrb[6].mxu0 %vm1165_vm1, %v6173_v4 }
 0x110   : > { %5323 = vmatmul.mubr.msk.f32.gmra.mrb[6].mxu1 %vm1165_vm1, %v6197_v8  ;;  %5169 = vmatprep.mubr.msk.f32.mxu0 %vm1165_vm1, %v6175_v5 }
 0x111   : > { %5325 = vmatprep.mubr.msk.f32.mxu1 %vm1165_vm1, %v6199_v10 }
 0x113   : > { %5170 = vmatmul.mubr.msk.f32.gmra.mrb[8].mxu0 %vm1165_vm1, %v6185_v6 }
 0x114   : > { %5326 = vmatmul.mubr.msk.f32.gmra.mrb[8].mxu1 %vm1165_vm1, %v6209_v13  ;;  %5172 = vmatprep.mubr.msk.f32.mxu0 %vm1165_vm1, %v6187_v7 }
 0x115   : > { %5328 = vmatprep.mubr.msk.f32.mxu1 %vm1165_vm1, %v6211_v15 }
 0x117   : > { %5173 = vmatmul.mubr.msk.f32.gmra.mrb[10].mxu0 %vm1165_vm1, %v6197_v8 }
 0x118   : > { %5329 = vmatmul.mubr.msk.f32.gmra.mrb[10].mxu1 %vm1165_vm1, %v6221_v16  ;;  %5175 = vmatprep.mubr.msk.f32.mxu0 %vm1165_vm1, %v6199_v10 }
 0x119   : > { %5331 = vmatprep.mubr.msk.f32.mxu1 %vm1165_vm1, %v3756_v23 }
 0x11b   : > { %5176 = vmatmul.mubr.msk.f32.gmra.mrb[12].mxu0 %vm1165_vm1, %v6209_v13 }
 0x11c   : > { %5332 = vmatmul.mubr.msk.f32.gmra.mrb[12].mxu1 %vm1165_vm1, %v3757_v43  ;;  %5178 = vmatprep.mubr.msk.f32.mxu0 %vm1165_vm1, %v6211_v15 }
 0x11d   : > { %5334 = vmatprep.mubr.msk.f32.mxu1 %vm1165_vm1, %v3758_v55 }
 0x11f   : > { %5179 = vmatmul.mubr.msk.f32.gmra.mrb[14].mxu0 %vm1165_vm1, %v6221_v16 }
 0x120   : > { %5335 = vmatmul.mubr.msk.f32.gmra.mrb[14].mxu1 %vm1165_vm1, %v3759_v56  ;;  %5183 = vmatprep.mubr.msk.f32.mxu0 %vm1165_vm1, %v6013_v38  ;;  %v3986_v38 = vld [vmem:[#allocation2 + $0xc9] sm:$0xff] }
 0x121   : > { %5339 = vmatprep.mubr.msk.f32.mxu1 %vm1165_vm1, %v6042_v19 }
 0x123   : > { %5184 = vmatmul.mubr.msk.f32.vlgmr.msra.gmra.mrb[0].mxu0 %vm1165_vm1, %v6020_v21  ;;  %v3987_v21 = vld [vmem:[#allocation2 + $0xd1] sm:$0xff] }
 0x124   : > { %5340 = vmatmul.mubr.msk.f32.vlgmr.msra.gmra.mrb[0].mxu1 %vm1165_vm1, %v6057_v44  ;;  %5208 = vmatpush3.msk.msra.mxu0 %vm1782_vm2, %v4741_v40 }
 0x125   : > { %5364 = vmatpush3.msk.msra.mxu1 %vm1782_vm2, %v4850_v22  ;;  %5186 = vmatprep.mubr.msk.f32.mxu0 %vm1165_vm1, %v6030_v41  ;;  %v3988_v41 = vld [vmem:[#allocation2 + $0xd9] sm:$0xff] }
 0x126   : > { %5342 = vmatprep.mubr.msk.f32.mxu1 %vm1165_vm1, %v6060_v45 }
 0x127   : > { %5187 = vmatmul.mubr.msk.f32.gmra.mrb[2].mxu0 %vm1165_vm1, %v6037_v42  ;;  %v3989_v42 = vld [vmem:[#allocation2 + $0xe1] sm:$0xff] }
 0x128   : > { %5343 = vmatmul.mubr.msk.f32.gmra.mrb[2].mxu1 %vm1165_vm1, %v6071_v46  ;;  %5189 = vmatprep.mubr.msk.f32.mxu0 %vm1165_vm1, %v6042_v19  ;;  %v4216_v19 = vld [vmem:[#allocation2 + $0xca] sm:$0xff] }
 0x129   : > { %5345 = vmatprep.mubr.msk.f32.mxu1 %vm1165_vm1, %v6073_v47 }
 0x12b   : > { %5190 = vmatmul.mubr.msk.f32.gmra.mrb[4].mxu0 %vm1165_vm1, %v6057_v44  ;;  %v4217_v44 = vld [vmem:[#allocation2 + $0xd2] sm:$0xff] }
 0x12c   : > { %5346 = vmatmul.mubr.msk.f32.gmra.mrb[4].mxu1 %vm1165_vm1, %v6083_v48  ;;  %5192 = vmatprep.mubr.msk.f32.mxu0 %vm1165_vm1, %v6060_v45  ;;  %v4218_v45 = vld [vmem:[#allocation2 + $0xda] sm:$0xff] }
 0x12d   : > { %5348 = vmatprep.mubr.msk.f32.mxu1 %vm1165_vm1, %v6085_v49 }
 0x12f   : > { %5193 = vmatmul.mubr.msk.f32.gmra.mrb[6].mxu0 %vm1165_vm1, %v6071_v46  ;;  %v4219_v46 = vld [vmem:[#allocation2 + $0xe2] sm:$0xff] }
 0x130   : > { %5349 = vmatmul.mubr.msk.f32.gmra.mrb[6].mxu1 %vm1165_vm1, %v6095_v50  ;;  %5195 = vmatprep.mubr.msk.f32.mxu0 %vm1165_vm1, %v6073_v47  ;;  %v6524_v47 = vld [vmem:[%s6671_s2] ss:$0 sm:$0xff] }
 0x131   : > { %5351 = vmatprep.mubr.msk.f32.mxu1 %vm1165_vm1, %v6097_v51 }
 0x133   : > { %5196 = vmatmul.mubr.msk.f32.gmra.mrb[8].mxu0 %vm1165_vm1, %v6083_v48 }
 0x134   : > { %5352 = vmatmul.mubr.msk.f32.gmra.mrb[8].mxu1 %vm1165_vm1, %v6107_v52  ;;  %5198 = vmatprep.mubr.msk.f32.mxu0 %vm1165_vm1, %v6085_v49 }
 0x135   : > { %5354 = vmatprep.mubr.msk.f32.mxu1 %vm1165_vm1, %v6109_v53 }
 0x137   : > { %5199 = vmatmul.mubr.msk.f32.gmra.mrb[10].mxu0 %vm1165_vm1, %v6095_v50 }
 0x138   : > { %5355 = vmatmul.mubr.msk.f32.gmra.mrb[10].mxu1 %vm1165_vm1, %v6119_v54  ;;  %5201 = vmatprep.mubr.msk.f32.mxu0 %vm1165_vm1, %v6097_v51 }
 0x139   : > { %5357 = vmatprep.mubr.msk.f32.mxu1 %vm1165_vm1, %v3986_v38 }
 0x13b   : > { %5202 = vmatmul.mubr.msk.f32.gmra.mrb[12].mxu0 %vm1165_vm1, %v6107_v52 }
 0x13c   : > { %5358 = vmatmul.mubr.msk.f32.gmra.mrb[12].mxu1 %vm1165_vm1, %v3987_v21  ;;  %5204 = vmatprep.mubr.msk.f32.mxu0 %vm1165_vm1, %v6109_v53 }
 0x13d   : > { %5360 = vmatprep.mubr.msk.f32.mxu1 %vm1165_vm1, %v3988_v41 }
 0x13f   : > { %5205 = vmatmul.mubr.msk.f32.gmra.mrb[14].mxu0 %vm1165_vm1, %v6119_v54 }
 0x140   : > { %5361 = vmatmul.mubr.msk.f32.gmra.mrb[14].mxu1 %vm1165_vm1, %v3989_v42  ;;  %5209 = vmatprep.mubr.msk.f32.mxu0 %vm1165_vm1, %v6223_v18 }
 0x141   : > { %5365 = vmatprep.mubr.msk.f32.mxu1 %vm1165_vm1, %v6252_v32 }
 0x143   : > { %5210 = vmatmul.mubr.msk.f32.vlgmr.msra.gmra.mrb[0].mxu0 %vm1165_vm1, %v6232_v24 }
 0x144   : > { %5366 = vmatmul.mubr.msk.f32.vlgmr.msra.gmra.mrb[0].mxu1 %vm1165_vm1, %v6263_v9  ;;  %5212 = vmatprep.mubr.msk.f32.mxu0 %vm1165_vm1, %v6235_v26 }
 0x145   : > { %5368 = vmatprep.mubr.msk.f32.mxu1 %vm1165_vm1, %v6265_v33 }
 0x147   : > { %5213 = vmatmul.mubr.msk.f32.gmra.mrb[2].mxu0 %vm1165_vm1, %v6248_v30 }
 0x148   : > { %5369 = vmatmul.mubr.msk.f32.gmra.mrb[2].mxu1 %vm1165_vm1, %v6275_v31  ;;  %5215 = vmatprep.mubr.msk.f32.mxu0 %vm1165_vm1, %v6252_v32 }
 0x149   : > { %5371 = vmatprep.mubr.msk.f32.mxu1 %vm1165_vm1, %v6277_v34 }
 0x14b   : > { %5216 = vmatmul.mubr.msk.f32.gmra.mrb[4].mxu0 %vm1165_vm1, %v6263_v9 }
 0x14c   : > { %5372 = vmatmul.mubr.msk.f32.gmra.mrb[4].mxu1 %vm1165_vm1, %v6287_v35  ;;  %5218 = vmatprep.mubr.msk.f32.mxu0 %vm1165_vm1, %v6265_v33 }
 0x14d   : > { %5374 = vmatprep.mubr.msk.f32.mxu1 %vm1165_vm1, %v6289_v36 }
 0x14f   : > { %5219 = vmatmul.mubr.msk.f32.gmra.mrb[6].mxu0 %vm1165_vm1, %v6275_v31 }
 0x150   : > { %5375 = vmatmul.mubr.msk.f32.gmra.mrb[6].mxu1 %vm1165_vm1, %v6299_v11  ;;  %5221 = vmatprep.mubr.msk.f32.mxu0 %vm1165_vm1, %v6277_v34 }
 0x151   : > { %5377 = vmatprep.mubr.msk.f32.mxu1 %vm1165_vm1, %v6301_v37 }
 0x153   : > { %5222 = vmatmul.mubr.msk.f32.gmra.mrb[8].mxu0 %vm1165_vm1, %v6287_v35 }
 0x154   : > { %5378 = vmatmul.mubr.msk.f32.gmra.mrb[8].mxu1 %vm1165_vm1, %v6311_v12  ;;  %5224 = vmatprep.mubr.msk.f32.mxu0 %vm1165_vm1, %v6289_v36 }
 0x155   : > { %5380 = vmatprep.mubr.msk.f32.mxu1 %vm1165_vm1, %v6313_v14 }
 0x157   : > { %5225 = vmatmul.mubr.msk.f32.gmra.mrb[10].mxu0 %vm1165_vm1, %v6299_v11 }
 0x158   : > { %5381 = vmatmul.mubr.msk.f32.gmra.mrb[10].mxu1 %vm1165_vm1, %v6323_v39  ;;  %5227 = vmatprep.mubr.msk.f32.mxu0 %vm1165_vm1, %v6301_v37 }
 0x159   : > { %5383 = vmatprep.mubr.msk.f32.mxu1 %vm1165_vm1, %v4216_v19 }
 0x15b   : > { %5228 = vmatmul.mubr.msk.f32.gmra.mrb[12].mxu0 %vm1165_vm1, %v6311_v12 }
 0x15c   : > { %5384 = vmatmul.mubr.msk.f32.gmra.mrb[12].mxu1 %vm1165_vm1, %v4217_v44  ;;  %5230 = vmatprep.mubr.msk.f32.mxu0 %vm1165_vm1, %v6313_v14 }
 0x15d   : > { %5386 = vmatprep.mubr.msk.f32.mxu1 %vm1165_vm1, %v4218_v45 }
 0x15f   : > { %5231 = vmatmul.mubr.msk.f32.gmra.mrb[14].mxu0 %vm1165_vm1, %v6323_v39 }
 0x160   : > { %5387 = vmatmul.mubr.msk.f32.gmra.mrb[14].mxu1 %vm1165_vm1, %v4219_v46 }
 0x216   : > { %v5211_v48 = vpop.f32.mrb[0].mxu0 }
 0x217   : > { %v3054_v49 = vadd.f32 %v5211_v48, %v6524_v47  ;;  %v5367_v50 = vpop.f32.mrb[0].mxu1  ;;  %v2952_v51 = vpop.f32.mrb[1].mxu0 }
 0x218   : > { %v4435_v52 = vadd.f32 %v5367_v50, %v6524_v47  ;;  %v3053_v53 = vadd.f32 %v6524_v47, %v2952_v51  ;;  %v4339_v54 = vpop.f32.mrb[1].mxu1 }
 0x219   : > { %3070 = vst.msk [vmem:[#allocation3 + $0x8] sm:$0xff] %vm1165_vm1, %v3054_v49  ;;  %v4434_v57 = vadd.f32 %v6524_v47, %v4339_v54 }
 0x21a   : > { %4452 = vst.msk [vmem:[#allocation3 + $0x28] sm:$0xff] %vm1165_vm1, %v4435_v52  ;;  %3069 = vst.msk [vmem:[#allocation3] sm:$0xff] %vm1165_vm1, %v3053_v53  ;;  %v5214_v58 = vpop.f32.mrb[2].mxu0 }
 0x21b   : > { %4451 = vst.msk [vmem:[#allocation3 + $0x20] sm:$0xff] %vm1165_vm1, %v4434_v57  ;;  %v3056_v59 = vadd.f32 %v5214_v58, %v6524_v47  ;;  %v5370_v60 = vpop.f32.mrb[2].mxu1  ;;  %v2962_v61 = vpop.f32.mrb[3].mxu0 }
 0x21c   : > { %v4437_v62 = vadd.f32 %v5370_v60, %v6524_v47  ;;  %v3055_v63 = vadd.f32 %v6524_v47, %v2962_v61  ;;  %v4349_v0 = vpop.f32.mrb[3].mxu1 }
 0x21d   : > { %3072 = vst.msk [vmem:[#allocation3 + $0x18] sm:$0xff] %vm1165_vm1, %v3056_v59  ;;  %v4436_v1 = vadd.f32 %v6524_v47, %v4349_v0 }
 0x21e   : > { %4454 = vst.msk [vmem:[#allocation3 + $0x38] sm:$0xff] %vm1165_vm1, %v4437_v62  ;;  %3071 = vst.msk [vmem:[#allocation3 + $0x10] sm:$0xff] %vm1165_vm1, %v3055_v63  ;;  %v5217_v2 = vpop.f32.mrb[4].mxu0 }
 0x21f   : > { %4453 = vst.msk [vmem:[#allocation3 + $0x30] sm:$0xff] %vm1165_vm1, %v4436_v1  ;;  %v3058_v3 = vadd.f32 %v5217_v2, %v6524_v47  ;;  %v5373_v4 = vpop.f32.mrb[4].mxu1  ;;  %v2972_v5 = vpop.f32.mrb[5].mxu0 }
 0x220   : > { %v4468_v6 = vld [vmem:[#allocation3 + $0x8] sm:$0xff]  ;;  %v4439_v7 = vadd.f32 %v5373_v4, %v6524_v47  ;;  %v3057_v8 = vadd.f32 %v6524_v47, %v2972_v5  ;;  %v4359_v10 = vpop.f32.mrb[5].mxu1 }
 0x221   : > { %4500 = vst.msk [vmem:[%s5737_s6 + $0x8] sm:$0xff] %vm1165_vm1, %v4468_v6  ;;  %v4472_v13 = vld [vmem:[#allocation3 + $0x28] sm:$0xff]  ;;  %v4467_v15 = vld [vmem:[#allocation3] sm:$0xff]  ;;  %3074 = vst.msk [vmem:[#allocation3 + $0x48] sm:$0xff] %vm1165_vm1, %v3058_v3  ;;  %v4438_v16 = vadd.f32 %v6524_v47, %v4359_v10 }
 0x222   : > { %4504 = vst.msk [vmem:[%s5737_s6 + $0x28] sm:$0xff] %vm1165_vm1, %v4472_v13  ;;  %4499 = vst.msk [vmem:[%s5737_s6] sm:$0xff] %vm1165_vm1, %v4467_v15  ;;  %v4471_v17 = vld [vmem:[#allocation3 + $0x20] sm:$0xff]  ;;  %v5220_v18 = vpop.f32.mrb[6].mxu0 }
 0x223   : > { %4456 = vst.msk [vmem:[#allocation3 + $0x68] sm:$0xff] %vm1165_vm1, %v4439_v7  ;;  %3073 = vst.msk [vmem:[#allocation3 + $0x40] sm:$0xff] %vm1165_vm1, %v3057_v8  ;;  %v3060_v20 = vadd.f32 %v5220_v18, %v6524_v47  ;;  %v5376_v24 = vpop.f32.mrb[6].mxu1  ;;  %v2982_v25 = vpop.f32.mrb[7].mxu0 }
 0x224   : > { %4503 = vst.msk [vmem:[%s5737_s6 + $0x20] sm:$0xff] %vm1165_vm1, %v4471_v17  ;;  %4455 = vst.msk [vmem:[#allocation3 + $0x60] sm:$0xff] %vm1165_vm1, %v4438_v16  ;;  %v4470_v26 = vld [vmem:[#allocation3 + $0x18] sm:$0xff]  ;;  %v4441_v27 = vadd.f32 %v5376_v24, %v6524_v47  ;;  %v3059_v28 = vadd.f32 %v6524_v47, %v2982_v25  ;;  %v4369_v29 = vpop.f32.mrb[7].mxu1 }
 0x225   : > { %4502 = vst.msk [vmem:[%s5737_s6 + $0x18] sm:$0xff] %vm1165_vm1, %v4470_v26  ;;  %v4474_v30 = vld [vmem:[#allocation3 + $0x38] sm:$0xff]  ;;  %v4469_v32 = vld [vmem:[#allocation3 + $0x10] sm:$0xff]  ;;  %3076 = vst.msk [vmem:[#allocation3 + $0x58] sm:$0xff] %vm1165_vm1, %v3060_v20  ;;  %v4440_v9 = vadd.f32 %v6524_v47, %v4369_v29 }
 0x226   : > { %4506 = vst.msk [vmem:[%s5737_s6 + $0x38] sm:$0xff] %vm1165_vm1, %v4474_v30  ;;  %4501 = vst.msk [vmem:[%s5737_s6 + $0x10] sm:$0xff] %vm1165_vm1, %v4469_v32  ;;  %v4473_v33 = vld [vmem:[#allocation3 + $0x30] sm:$0xff]  ;;  %v5223_v31 = vpop.f32.mrb[8].mxu0 }
 0x227   : > { %4458 = vst.msk [vmem:[#allocation3 + $0x78] sm:$0xff] %vm1165_vm1, %v4441_v27  ;;  %3075 = vst.msk [vmem:[#allocation3 + $0x50] sm:$0xff] %vm1165_vm1, %v3059_v28  ;;  %v3062_v34 = vadd.f32 %v5223_v31, %v6524_v47  ;;  %v5379_v35 = vpop.f32.mrb[8].mxu1  ;;  %v2992_v36 = vpop.f32.mrb[9].mxu0 }
 0x228   : > { %4505 = vst.msk [vmem:[%s5737_s6 + $0x30] sm:$0xff] %vm1165_vm1, %v4473_v33  ;;  %4457 = vst.msk [vmem:[#allocation3 + $0x70] sm:$0xff] %vm1165_vm1, %v4440_v9  ;;  %v4476_v11 = vld [vmem:[#allocation3 + $0x48] sm:$0xff]  ;;  %v4443_v37 = vadd.f32 %v5379_v35, %v6524_v47  ;;  %v3061_v12 = vadd.f32 %v6524_v47, %v2992_v36  ;;  %v4379_v14 = vpop.f32.mrb[9].mxu1 }
 0x229   : > { %4508 = vst.msk [vmem:[%s5737_s6 + $0x48] sm:$0xff] %vm1165_vm1, %v4476_v11  ;;  %3078 = vst.msk [vmem:[#allocation3 + $0x88] sm:$0xff] %vm1165_vm1, %v3062_v34  ;;  %v4442_v22 = vadd.f32 %v6524_v47, %v4379_v14 }
 0x22a   : > { %v4480_v39 = vld [vmem:[#allocation3 + $0x68] sm:$0xff]  ;;  %v4475_v40 = vld [vmem:[#allocation3 + $0x40] sm:$0xff]  ;;  %4460 = vst.msk [vmem:[#allocation3 + $0xa8] sm:$0xff] %vm1165_vm1, %v4443_v37  ;;  %3077 = vst.msk [vmem:[#allocation3 + $0x80] sm:$0xff] %vm1165_vm1, %v3061_v12  ;;  %v5226_v43 = vpop.f32.mrb[10].mxu0 }
 0x22b   : > { %4512 = vst.msk [vmem:[%s5737_s6 + $0x68] sm:$0xff] %vm1165_vm1, %v4480_v39  ;;  %4507 = vst.msk [vmem:[%s5737_s6 + $0x40] sm:$0xff] %vm1165_vm1, %v4475_v40  ;;  %v4479_v23 = vld [vmem:[#allocation3 + $0x60] sm:$0xff]  ;;  %v3064_v55 = vadd.f32 %v5226_v43, %v6524_v47  ;;  %v5382_v56 = vpop.f32.mrb[10].mxu1  ;;  %v3002_v38 = vpop.f32.mrb[11].mxu0 }
 0x22c   : > { %4511 = vst.msk [vmem:[%s5737_s6 + $0x60] sm:$0xff] %vm1165_vm1, %v4479_v23  ;;  %4459 = vst.msk [vmem:[#allocation3 + $0xa0] sm:$0xff] %vm1165_vm1, %v4442_v22  ;;  %v4478_v21 = vld [vmem:[#allocation3 + $0x58] sm:$0xff]  ;;  %v4445_v41 = vadd.f32 %v5382_v56, %v6524_v47  ;;  %v3063_v42 = vadd.f32 %v6524_v47, %v3002_v38  ;;  %v4389_v19 = vpop.f32.mrb[11].mxu1 }
 0x22d   : > { %4510 = vst.msk [vmem:[%s5737_s6 + $0x58] sm:$0xff] %vm1165_vm1, %v4478_v21  ;;  %3080 = vst.msk [vmem:[#allocation3 + $0x98] sm:$0xff] %vm1165_vm1, %v3064_v55  ;;  %v4444_v46 = vadd.f32 %v6524_v47, %v4389_v19 }
 0x22e   : > { %v4482_v44 = vld [vmem:[#allocation3 + $0x78] sm:$0xff]  ;;  %v4477_v45 = vld [vmem:[#allocation3 + $0x50] sm:$0xff]  ;;  %4462 = vst.msk [vmem:[#allocation3 + $0xb8] sm:$0xff] %vm1165_vm1, %v4445_v41  ;;  %3079 = vst.msk [vmem:[#allocation3 + $0x90] sm:$0xff] %vm1165_vm1, %v3063_v42  ;;  %v5229_v49 = vpop.f32.mrb[12].mxu0 }
 0x22f   : > { %4514 = vst.msk [vmem:[%s5737_s6 + $0x78] sm:$0xff] %vm1165_vm1, %v4482_v44  ;;  %4509 = vst.msk [vmem:[%s5737_s6 + $0x50] sm:$0xff] %vm1165_vm1, %v4477_v45  ;;  %v4481_v48 = vld [vmem:[#allocation3 + $0x70] sm:$0xff]  ;;  %v3066_v50 = vadd.f32 %v5229_v49, %v6524_v47  ;;  %v5385_v51 = vpop.f32.mrb[12].mxu1  ;;  %v3012_v52 = vpop.f32.mrb[13].mxu0 }
 0x230   : > { %4513 = vst.msk [vmem:[%s5737_s6 + $0x70] sm:$0xff] %vm1165_vm1, %v4481_v48  ;;  %4461 = vst.msk [vmem:[#allocation3 + $0xb0] sm:$0xff] %vm1165_vm1, %v4444_v46  ;;  %v4484_v53 = vld [vmem:[#allocation3 + $0x88] sm:$0xff]  ;;  %v4447_v54 = vadd.f32 %v5385_v51, %v6524_v47  ;;  %v3065_v57 = vadd.f32 %v6524_v47, %v3012_v52  ;;  %v4399_v58 = vpop.f32.mrb[13].mxu1 }
 0x231   : > { %4516 = vst.msk [vmem:[%s5737_s6 + $0x88] sm:$0xff] %vm1165_vm1, %v4484_v53  ;;  %v4488_v59 = vld [vmem:[#allocation3 + $0xa8] sm:$0xff]  ;;  %v4483_v60 = vld [vmem:[#allocation3 + $0x80] sm:$0xff]  ;;  %3082 = vst.msk [vmem:[#allocation3 + $0xc8] sm:$0xff] %vm1165_vm1, %v3066_v50  ;;  %v4446_v61 = vadd.f32 %v6524_v47, %v4399_v58 }
 0x232   : > { %4520 = vst.msk [vmem:[%s5737_s6 + $0xa8] sm:$0xff] %vm1165_vm1, %v4488_v59  ;;  %4515 = vst.msk [vmem:[%s5737_s6 + $0x80] sm:$0xff] %vm1165_vm1, %v4483_v60  ;;  %v5232_v63 = vpop.f32.mrb[14].mxu0 }
 0x233   : > { %v4487_v62 = vld [vmem:[#allocation3 + $0xa0] sm:$0xff]  ;;  %4464 = vst.msk [vmem:[#allocation3 + $0xe8] sm:$0xff] %vm1165_vm1, %v4447_v54  ;;  %3081 = vst.msk [vmem:[#allocation3 + $0xc0] sm:$0xff] %vm1165_vm1, %v3065_v57  ;;  %v3068_v0 = vadd.f32 %v5232_v63, %v6524_v47  ;;  %v5388_v1 = vpop.f32.mrb[14].mxu1  ;;  %v3022_v2 = vpop.f32.mrb[15].mxu0 }
 0x234   : > { %4519 = vst.msk [vmem:[%s5737_s6 + $0xa0] sm:$0xff] %vm1165_vm1, %v4487_v62  ;;  %4463 = vst.msk [vmem:[#allocation3 + $0xe0] sm:$0xff] %vm1165_vm1, %v4446_v61  ;;  %v4486_v3 = vld [vmem:[#allocation3 + $0x98] sm:$0xff]  ;;  %v4449_v4 = vadd.f32 %v5388_v1, %v6524_v47  ;;  %v3067_v5 = vadd.f32 %v6524_v47, %v3022_v2  ;;  %v4409_v6 = vpop.f32.mrb[15].mxu1 }
 0x235   : > { %4518 = vst.msk [vmem:[%s5737_s6 + $0x98] sm:$0xff] %vm1165_vm1, %v4486_v3  ;;  %v4490_v7 = vld [vmem:[#allocation3 + $0xb8] sm:$0xff]  ;;  %v4485_v8 = vld [vmem:[#allocation3 + $0x90] sm:$0xff]  ;;  %3084 = vst.msk [vmem:[#allocation3 + $0xd8] sm:$0xff] %vm1165_vm1, %v3068_v0  ;;  %v4448_v10 = vadd.f32 %v6524_v47, %v4409_v6 }
 0x236   : > { %4522 = vst.msk [vmem:[%s5737_s6 + $0xb8] sm:$0xff] %vm1165_vm1, %v4490_v7  ;;  %4517 = vst.msk [vmem:[%s5737_s6 + $0x90] sm:$0xff] %vm1165_vm1, %v4485_v8 }
 0x237   : > { %v4489_v13 = vld [vmem:[#allocation3 + $0xb0] sm:$0xff]  ;;  %4466 = vst.msk [vmem:[#allocation3 + $0xf8] sm:$0xff] %vm1165_vm1, %v4449_v4  ;;  %3083 = vst.msk [vmem:[#allocation3 + $0xd0] sm:$0xff] %vm1165_vm1, %v3067_v5 }
 0x238   : > { %4521 = vst.msk [vmem:[%s5737_s6 + $0xb0] sm:$0xff] %vm1165_vm1, %v4489_v13  ;;  %4465 = vst.msk [vmem:[#allocation3 + $0xf0] sm:$0xff] %vm1165_vm1, %v4448_v10  ;;  %v4492_v15 = vld [vmem:[#allocation3 + $0xc8] sm:$0xff] }
 0x239   : > { %4524 = vst.msk [vmem:[%s5737_s6 + $0xc8] sm:$0xff] %vm1165_vm1, %v4492_v15 }
 0x23a   : > { %v4496_v47 = vld [vmem:[#allocation3 + $0xe8] sm:$0xff]  ;;  %v4491_v16 = vld [vmem:[#allocation3 + $0xc0] sm:$0xff] }
 0x23b   : > { %4528 = vst.msk [vmem:[%s5737_s6 + $0xe8] sm:$0xff] %vm1165_vm1, %v4496_v47  ;;  %4523 = vst.msk [vmem:[%s5737_s6 + $0xc0] sm:$0xff] %vm1165_vm1, %v4491_v16  ;;  %v4495_v17 = vld [vmem:[#allocation3 + $0xe0] sm:$0xff] }
 0x23c   : > { %4527 = vst.msk [vmem:[%s5737_s6 + $0xe0] sm:$0xff] %vm1165_vm1, %v4495_v17  ;;  %v4494_v18 = vld [vmem:[#allocation3 + $0xd8] sm:$0xff] }
 0x23d   : > { %4526 = vst.msk [vmem:[%s5737_s6 + $0xd8] sm:$0xff] %vm1165_vm1, %v4494_v18 }
 0x23e   : > { %v4498_v20 = vld [vmem:[#allocation3 + $0xf8] sm:$0xff]  ;;  %v4493_v24 = vld [vmem:[#allocation3 + $0xd0] sm:$0xff] }
 0x23f   : > { %4530 = vst.msk [vmem:[%s5737_s6 + $0xf8] sm:$0xff] %vm1165_vm1, %v4498_v20  ;;  %4525 = vst.msk [vmem:[%s5737_s6 + $0xd0] sm:$0xff] %vm1165_vm1, %v4493_v24  ;;  %v4497_v25 = vld [vmem:[#allocation3 + $0xf0] sm:$0xff] }
 0x240   : > { %4529 = vst.msk [vmem:[%s5737_s6 + $0xf0] sm:$0xff] %vm1165_vm1, %v4497_v25 }
 0x241 PF: > { %s13_s16 = sadd.s32 1, %s5632_s16   ;;  %s6673_s12 = smov %s5624_s14 }
 0x242   : > { %p10_p11 = scmp.ge.s32.totalorder %s13_s16, 10   ;;  %s6674_s13 = smov %s5628_s15 }
 0x243   : > { %s6675_s14 = smov %s6678_s17  ;;  %s6676_s15 = smov %s6682_s18 }
 0x244   :  { %12 = sbr.rel (!%p10_p11) target bundleno = 3 (0x3), region = 97 }

</bundles_post_ra>
